<compile_context>
chip_gen: v7x
topology: tpu7x:2x2x1
jax: 0.10.0
libtpu: 0.0.40
codegen_flags: <defaults>
</compile_context>

<pallas_src>
import numpy as np
from functools import partial

import jax
import jax.numpy as jnp
from jax import lax
from jax.experimental import pallas as pl
from jax.experimental.pallas import tpu as pltpu

LN_EPS = 1e-5     # nn.LayerNorm default eps
L2_EPS = 1e-12    # F.normalize default eps
_VMEM_LIMIT = 64 * 1024 * 1024   # explicit scoped-VMEM cap (safe on v5e/v6e/v7x)


# ----------------------------------------------------------------------------
# Tile-size helpers
# ----------------------------------------------------------------------------
def _tile_m(m, target=512):
    # Row tile over M = B*N (512 ≈ 85% of HBM roofline on mem-bound kernels).
    return m if m <= target else target


def _tile_k(k, target=512):
    # Reduction tile; only split K when it is large and splits exactly.
    if k <= 1024:
        return k
    for t in (target, 256, 128):
        if k % t == 0:
            return t
    return k


def _tile_n(n, k_rows, itemsize, budget=16 * 1024 * 1024):
    # Split the output/weight column dim only when the grid-resident weight
    # (double-buffered by the pipeline) would not comfortably fit in VMEM.
    if 2 * k_rows * n * itemsize <= budget:
        return n
    for t in (2048, 1024, 512, 256):
        if n % t == 0:
            return t
    return n


# ----------------------------------------------------------------------------
# Fused LayerNorm + matmul (no bias).  Also emits the normalized activation
# (needed by gen_weights), saving a full LN round-trip through HBM.
# Outputs are stored in the activation dtype (bf16 in production).
# ----------------------------------------------------------------------------
def _ln_matmul_kernel(x_ref, g_ref, b_ref, w_ref, y_ref, xn_ref):
    x = x_ref[...].astype(jnp.float32)
    mean = jnp.mean(x, axis=-1, keepdims=True)
    xc = x - mean
    var = jnp.mean(xc * xc, axis=-1, keepdims=True)
    xn = xc * lax.rsqrt(var + LN_EPS) * g_ref[...] + b_ref[...]
    xn_ref[...] = xn.astype(xn_ref.dtype)
    y_ref[...] = jnp.dot(xn.astype(w_ref.dtype), w_ref[...],
                         preferred_element_type=jnp.float32).astype(y_ref.dtype)


def ln_matmul(x2d, gamma, beta, w, *, act_dtype):
    m, c = x2d.shape
    n = w.shape[1]
    tm = _tile_m(m)
    return pl.pallas_call(
        _ln_matmul_kernel,
        grid=(pl.cdiv(m, tm),),
        in_specs=[
            pl.BlockSpec((tm, c), lambda i: (i, 0)),
            pl.BlockSpec((1, c), lambda i: (0, 0)),
            pl.BlockSpec((1, c), lambda i: (0, 0)),
            pl.BlockSpec((c, n), lambda i: (0, 0)),          # weight grid-resident
        ],
        out_specs=(
            pl.BlockSpec((tm, n), lambda i: (i, 0)),
            pl.BlockSpec((tm, c), lambda i: (i, 0)),
        ),
        out_shape=(
            jax.ShapeDtypeStruct((m, n), act_dtype),
            jax.ShapeDtypeStruct((m, c), act_dtype),
        ),
        compiler_params=pltpu.CompilerParams(
            dimension_semantics=("parallel",),
            vmem_limit_bytes=_VMEM_LIMIT),
    )(x2d, gamma, beta, w)


# ----------------------------------------------------------------------------
# Fused LayerNorm + fc1 matmul + bias + GELU  (norm2 -> fc1 -> GELU)
# Optional column tiling of the (C, 4C) weight so v7x's 64 MiB VMEM is respected.
# ----------------------------------------------------------------------------
def _ln_matmul_bias_gelu_kernel(x_ref, g_ref, bt_ref, w_ref, b_ref, o_ref, *,
                                approx_gelu):
    x = x_ref[...].astype(jnp.float32)
    mean = jnp.mean(x, axis=-1, keepdims=True)
    xc = x - mean
    var = jnp.mean(xc * xc, axis=-1, keepdims=True)
    xn = xc * lax.rsqrt(var + LN_EPS) * g_ref[...] + bt_ref[...]
    y = jnp.dot(xn.astype(w_ref.dtype), w_ref[...],
                preferred_element_type=jnp.float32) + b_ref[...]
    if approx_gelu:
        y = jax.nn.gelu(y, approximate=True)      # tanh approx (optional, EUP)
    else:
        y = 0.5 * y * (1.0 + lax.erf(y * (1.0 / np.sqrt(2.0))))  # nn.GELU default
    o_ref[...] = y.astype(o_ref.dtype)


def ln_matmul_bias_gelu(x2d, gamma, beta, w, b, *, act_dtype, approx_gelu=False):
    m, c = x2d.shape
    n = w.shape[1]
    tm = _tile_m(m)
    tn = _tile_n(n, c, jnp.dtype(w.dtype).itemsize)
    kernel = partial(_ln_matmul_bias_gelu_kernel, approx_gelu=approx_gelu)
    return pl.pallas_call(
        kernel,
        grid=(pl.cdiv(m, tm), pl.cdiv(n, tn)),
        in_specs=[
            pl.BlockSpec((tm, c), lambda i, j: (i, 0)),      # stays resident over j
            pl.BlockSpec((1, c), lambda i, j: (0, 0)),
            pl.BlockSpec((1, c), lambda i, j: (0, 0)),
            pl.BlockSpec((c, tn), lambda i, j: (0, j)),
            pl.BlockSpec((1, tn), lambda i, j: (0, j)),
        ],
        out_specs=pl.BlockSpec((tm, tn), lambda i, j: (i, j)),
        out_shape=jax.ShapeDtypeStruct((m, n), act_dtype),
        compiler_params=pltpu.CompilerParams(
            dimension_semantics=("parallel", "parallel"),
            vmem_limit_bytes=_VMEM_LIMIT),
    )(x2d, gamma, beta, w, b)


# ----------------------------------------------------------------------------
# K-tiled matmul + bias + residual (proj + residual, fc2 + residual).
# Accumulates directly into the f32 output block (no scratch accumulator).
# ----------------------------------------------------------------------------
def _matmul_bias_resid_kernel(x_ref, w_ref, b_ref, r_ref, o_ref):
    @pl.when(pl.program_id(1) == 0)
    def _():
        o_ref[...] = jnp.zeros_like(o_ref)

    o_ref[...] += jnp.dot(x_ref[...], w_ref[...],
                          preferred_element_type=jnp.float32)

    @pl.when(pl.program_id(1) == pl.num_programs(1) - 1)
    def _():
        o_ref[...] += b_ref[...] + r_ref[...]


def matmul_bias_residual(x2d, w, b, resid):
    m, k = x2d.shape
    n = w.shape[1]
    tm = _tile_m(m)
    tk = _tile_k(k)
    return pl.pallas_call(
        _matmul_bias_resid_kernel,
        grid=(pl.cdiv(m, tm), pl.cdiv(k, tk)),
        in_specs=[
            pl.BlockSpec((tm, tk), lambda i, kk: (i, kk)),
            pl.BlockSpec((tk, n), lambda i, kk: (kk, 0)),
            pl.BlockSpec((1, n), lambda i, kk: (0, 0)),
            pl.BlockSpec((tm, n), lambda i, kk: (i, 0)),
        ],
        out_specs=pl.BlockSpec((tm, n), lambda i, kk: (i, 0)),
        out_shape=jax.ShapeDtypeStruct((m, n), jnp.float32),
        compiler_params=pltpu.CompilerParams(
            dimension_semantics=("parallel", "arbitrary"),
            vmem_limit_bytes=_VMEM_LIMIT),
    )(x2d, w, b, resid)


# ----------------------------------------------------------------------------
# Primal attention core: one program per batch element, all heads batched.
#   qk_ref   : (1, N, 2C)   [q heads | k heads] slab (not yet L2-normalized)
#   xn_ref   : (1, Nl, C)   norm1(x) (optionally token-subsampled), Nl == Lw
#   weB/wrB  : (Lw, H*R)    we/wr rearranged so gen_weights is one matmul
#   mask_ref : (C, H*R)     head block-diagonal 0/1 mask (kills cross-head terms)
#   wceB/wcrB: (H*R, C)     block-diagonal halves of concate_weight
#   bc_ref   : (1, C)       concate_weight bias tiled across heads
# Outputs: attn (1, N, C) merged-head lane-dense, es/rs (1, N, H*R) lane-dense.
# ----------------------------------------------------------------------------
def _primal_attn_kernel(qk_ref, xn_ref, weB_ref, wrB_ref, mask_ref,
                        wceB_ref, wcrB_ref, bc_ref,
                        attn_ref, es_ref, rs_ref,
                        qn_scr, kn_scr, *, num_heads, head_dim):
    H, hd = num_heads, head_dim
    C = H * hd
    cdt = weB_ref.dtype

    # gen_weights for all heads in one MXU matmul (contract over tokens), then
    # zero the cross-head blocks:  Mwe[h*hd+d, h*R+e] = sum_n xn[n, h*hd+d]*we[h,n,e]
    xn = xn_ref[0]                                                   # (Nl, C)
    Mwe = lax.dot_general(xn, weB_ref[...], (((0,), (0,)), ((), ())),
                          preferred_element_type=jnp.float32) * mask_ref[...]
    Mwr = lax.dot_general(xn, wrB_ref[...], (((0,), (0,)), ((), ())),
                          preferred_element_type=jnp.float32) * mask_ref[...]

    # Per-head L2 normalization (F.normalize, p=2, dim=-1), f32 math + EUP rsqrt.
    # Each head is written straight into a VMEM scratch slab (bounded live ranges).
    qk = qk_ref[0]                                                   # (N, 2C)
    eps2 = L2_EPS * L2_EPS
    for h in range(H):
        q = qk[:, h * hd:(h + 1) * hd].astype(jnp.float32)
        k = qk[:, C + h * hd:C + (h + 1) * hd].astype(jnp.float32)
        qs = jnp.maximum(jnp.sum(q * q, axis=-1, keepdims=True), eps2)
        ks = jnp.maximum(jnp.sum(k * k, axis=-1, keepdims=True), eps2)
        qn_scr[:, h * hd:(h + 1) * hd] = (q * lax.rsqrt(qs)).astype(qn_scr.dtype)
        kn_scr[:, h * hd:(h + 1) * hd] = (k * lax.rsqrt(ks)).astype(kn_scr.dtype)

    qn = qn_scr[...]                                                 # (N, C)
    kn = kn_scr[...]

    # escore / rscore for all heads: single lane-dense (N, H*R) matmuls.
    es = jnp.dot(qn, Mwe.astype(cdt), preferred_element_type=jnp.float32)
    rs = jnp.dot(kn, Mwr.astype(cdt), preferred_element_type=jnp.float32)
    es_ref[0] = es.astype(es_ref.dtype)
    rs_ref[0] = rs.astype(rs_ref.dtype)

    # Shared concate_weight applied to all heads at once via block-diagonal
    # (H*R, C) weights -> attention output directly in merged-head (N, C) layout.
    attn = (jnp.dot(es.astype(cdt), wceB_ref[...], preferred_element_type=jnp.float32)
            + jnp.dot(rs.astype(cdt), wcrB_ref[...], preferred_element_type=jnp.float32)
            + bc_ref[...])
    attn_ref[0] = attn.astype(attn_ref.dtype)


def primal_attention_core(qk3, xn_g, weB, wrB, maskW, wceB, wcrB, bct, *,
                          num_heads, head_dim, low_rank, act_dtype):
    B, N, _ = qk3.shape
    H, hd, R = num_heads, head_dim, low_rank
    C = H * hd
    HR = H * R
    Nl = xn_g.shape[1]
    Lw = weB.shape[0]
    assert Nl == Lw, "gen_weights token dim must match we/wr"
    kernel = partial(_primal_attn_kernel, num_heads=H, head_dim=hd)
    return pl.pallas_call(
        kernel,
        grid=(B,),
        in_specs=[
            pl.BlockSpec((1, N, 2 * C), lambda b: (b, 0, 0)),
            pl.BlockSpec((1, Nl, C), lambda b: (b, 0, 0)),
            pl.BlockSpec((Lw, HR), lambda b: (0, 0)),    # grid-resident
            pl.BlockSpec((Lw, HR), lambda b: (0, 0)),
            pl.BlockSpec((C, HR), lambda b: (0, 0)),
            pl.BlockSpec((HR, C), lambda b: (0, 0)),
            pl.BlockSpec((HR, C), lambda b: (0, 0)),
            pl.BlockSpec((1, C), lambda b: (0, 0)),
        ],
        out_specs=(
            pl.BlockSpec((1, N, C), lambda b: (b, 0, 0)),
            pl.BlockSpec((1, N, HR), lambda b: (b, 0, 0)),
            pl.BlockSpec((1, N, HR), lambda b: (b, 0, 0)),
        ),
        out_shape=(
            jax.ShapeDtypeStruct((B, N, C), act_dtype),
            jax.ShapeDtypeStruct((B, N, HR), jnp.float32),
            jax.ShapeDtypeStruct((B, N, HR), jnp.float32),
        ),
        scratch_shapes=[pltpu.VMEM((N, C), act_dtype),
                        pltpu.VMEM((N, C), act_dtype)],
        compiler_params=pltpu.CompilerParams(
            dimension_semantics=("parallel",),
            vmem_limit_bytes=_VMEM_LIMIT),
    )(qk3, xn_g, weB, wrB, maskW, wceB, wcrB, bct)


# ----------------------------------------------------------------------------
# One-time parameter preparation: cast matmul weights to the compute dtype and
# build the block-diagonal layouts used by the attention kernel.
# ----------------------------------------------------------------------------
def prepare_params(p, num_heads, low_rank, compute_dtype):
    H, R = num_heads, low_rank
    dim = p["Wqk"].shape[0]
    hd = dim // H
    cdt = compute_dtype
    eyeH = jnp.eye(H, dtype=jnp.float32)

    weB = jnp.transpose(p["we"], (1, 0, 2)).reshape(-1, H * R)    # (Lw, H*R)
    wrB = jnp.transpose(p["wr"], (1, 0, 2)).reshape(-1, H * R)
    maskW = jnp.kron(eyeH, jnp.ones((hd, R), jnp.float32))        # (C, H*R)
    WceB = jnp.kron(eyeH, p["Wcat"][:R])                          # (H*R, C)
    WcrB = jnp.kron(eyeH, p["Wcat"][R:])
    bcat_t = jnp.tile(p["bcat"], (1, H))                          # (1, C)

    q = dict(p)
    q.update(
        Wqk_c=p["Wqk"].astype(cdt), Wproj_c=p["Wproj"].astype(cdt),
        W1_c=p["W1"].astype(cdt), W2_c=p["W2"].astype(cdt),
        weB_c=weB.astype(cdt), wrB_c=wrB.astype(cdt), maskW=maskW,
        WceB_c=WceB.astype(cdt), WcrB_c=WcrB.astype(cdt), bcat_t=bcat_t,
    )
    return q


# ----------------------------------------------------------------------------
# Block forward
# ----------------------------------------------------------------------------
@partial(jax.jit, static_argnames=("num_heads", "low_rank", "approx_gelu"))
def block_forward(x, p, *, num_heads, low_rank, approx_gelu=False):
    B, N, C = x.shape
    H = num_heads
    hd = C // H
    R = low_rank
    act_dtype = p["Wqk_c"].dtype      # bf16 in production, f32 for the check path

    x2d = x.reshape(B * N, C)

    # fused norm1 + qk projection (qk_bias=False); also emits norm1(x)
    qk2d, xn2d = ln_matmul(x2d, p["g1"], p["bt1"], p["Wqk_c"], act_dtype=act_dtype)
    qk3 = qk2d.reshape(B, N, 2 * C)
    xn3 = xn2d.reshape(B, N, C)

    # gen_weights input: norm1(x), optionally token-subsampled
    Lw = p["weB_c"].shape[0]
    if N > Lw:
        # TODO(synk): torch.linspace(..., dtype=int) rounding may differ by 1 index at non-exact steps.
        idx = np.linspace(0, N - 1, Lw).astype(np.int32)
        xn_g = xn3[:, idx, :]
    else:
        xn_g = xn3

    attn_bnc, es_slab, rs_slab = primal_attention_core(
        qk3, xn_g, p["weB_c"], p["wrB_c"], p["maskW"], p["WceB_c"], p["WcrB_c"],
        p["bcat_t"], num_heads=H, head_dim=hd, low_rank=R, act_dtype=act_dtype)

    # output projection + residual (drop_path / dropout = identity in eval)
    x1 = matmul_bias_residual(attn_bnc.reshape(B * N, C), p["Wproj_c"],
                              p["bproj"], x2d)

    # MLP branch: fused norm2 + fc1 + GELU, then K-tiled fc2 + residual
    h = ln_matmul_bias_gelu(x1, p["g2"], p["bt2"], p["W1_c"], p["b1"],
                            act_dtype=act_dtype, approx_gelu=approx_gelu)
    x_out = matmul_bias_residual(h, p["W2_c"], p["b2"], x1)
    x_out = x_out.reshape(B, N, C)

    # module-layout scores (B, H, N, R): cheap wrapper transpose of small tensors
    escore = es_slab.reshape(B, N, H, R).transpose(0, 2, 1, 3)
    rscore = rs_slab.reshape(B, N, H, R).transpose(0, 2, 1, 3)
    return x_out, [escore, rscore, p["we"], p["wr"]], p["Lambda"]


# ----------------------------------------------------------------------------
# Pure-JAX reference (same math, f32) for a sanity check
# ----------------------------------------------------------------------------
def reference_block(x, p, num_heads, low_rank):
    B, N, C = x.shape
    H = num_heads
    hd = C // H
    R = low_rank

    def ln(v, g, b):
        m = v.mean(-1, keepdims=True)
        var = ((v - m) ** 2).mean(-1, keepdims=True)
        return (v - m) / jnp.sqrt(var + LN_EPS) * g.reshape(-1) + b.reshape(-1)

    xn = ln(x, p["g1"], p["bt1"])
    qk = xn @ p["Wqk"]                                        # qk_bias=False
    qk = qk.reshape(B, N, 2, H, hd)
    q = qk[:, :, 0].transpose(0, 2, 1, 3)
    k = qk[:, :, 1].transpose(0, 2, 1, 3)

    xh = xn.reshape(B, N, H, hd).transpose(0, 2, 1, 3)        # (B,H,N,hd)
    Lw = p["we"].shape[1]
    if N > Lw:
        idx = np.linspace(0, N - 1, Lw).astype(np.int32)
        xh = xh[:, :, idx, :]
    We = jnp.einsum("bhnd,hne->bhde", xh, p["we"])
    Wr = jnp.einsum("bhnd,hne->bhde", xh, p["wr"])

    qn = q / jnp.maximum(jnp.sqrt(jnp.sum(q * q, -1, keepdims=True)), L2_EPS)
    kn = k / jnp.maximum(jnp.sqrt(jnp.sum(k * k, -1, keepdims=True)), L2_EPS)
    es = jnp.einsum("bhnd,bhde->bhne", qn, We)
    rs = jnp.einsum("bhnd,bhde->bhne", kn, Wr)
    score = jnp.concatenate([es, rs], axis=-1)
    attn = score @ p["Wcat"] + p["bcat"].reshape(-1)
    attn = attn.transpose(0, 2, 1, 3).reshape(B, N, C)
    x1 = x + (attn @ p["Wproj"] + p["bproj"].reshape(-1))

    xn2 = ln(x1, p["g2"], p["bt2"])
    hh = xn2 @ p["W1"] + p["b1"].reshape(-1)
    hh = 0.5 * hh * (1.0 + lax.erf(hh * (1.0 / np.sqrt(2.0))))
    x2 = x1 + (hh @ p["W2"] + p["b2"].reshape(-1))
    return x2, es, rs


# ----------------------------------------------------------------------------
def make_params(key, dim, num_heads, embed_len, low_rank, rank_multi, mlp_ratio):
    hd = dim // num_heads
    Lw = min(embed_len, low_rank * rank_multi)
    hidden = int(dim * mlp_ratio)
    ks = jax.random.split(key, 12)
    f32 = jnp.float32
    return dict(
        g1=jnp.ones((1, dim), f32), bt1=jnp.zeros((1, dim), f32),
        g2=jnp.ones((1, dim), f32), bt2=jnp.zeros((1, dim), f32),
        Wqk=0.05 * jax.random.normal(ks[0], (dim, 2 * dim), f32),   # qk_bias=False
        Wproj=0.05 * jax.random.normal(ks[1], (dim, dim), f32),
        bproj=0.02 * jax.random.normal(ks[2], (1, dim), f32),
        # synthetic stand-ins for nn.init.orthogonal_ (deterministic, not a checkpoint)
        we=0.1 * jax.random.normal(ks[3], (num_heads, Lw, low_rank), f32),
        wr=0.1 * jax.random.normal(ks[4], (num_heads, Lw, low_rank), f32),
        Lambda=jax.random.uniform(ks[5], (num_heads, low_rank), f32),
        Wcat=0.1 * jax.random.normal(ks[6], (2 * low_rank, hd), f32),
        bcat=0.02 * jax.random.normal(ks[7], (1, hd), f32),
        W1=0.05 * jax.random.normal(ks[8], (dim, hidden), f32),
        b1=0.02 * jax.random.normal(ks[9], (1, hidden), f32),
        W2=0.05 * jax.random.normal(ks[10], (hidden, dim), f32),
        b2=0.02 * jax.random.normal(ks[11], (1, dim), f32),
    )


if __name__ == "__main__":
    # Small shapes: B=2, N=embed_len=8, dim=32, heads=4 (head_dim=8),
    # low_rank=8, rank_multi=10 -> embed_len <= low_rank*rank_multi (no subsampling).
    B, N, dim = 2, 8, 32
    num_heads, low_rank, rank_multi, mlp_ratio = 4, 8, 10, 4.0

    key = jax.random.PRNGKey(0)
    kx, kp = jax.random.split(key)
    x = jax.random.normal(kx, (B, N, dim), jnp.float32)
    params = make_params(kp, dim, num_heads, N, low_rank, rank_multi, mlp_ratio)

    # Production path: bf16 weights + bf16 inter-kernel activations,
    # f32 LN/GELU/normalize math and f32 matmul accumulation.
    p_bf16 = prepare_params(params, num_heads, low_rank, jnp.bfloat16)
    out_bf, scores_bf, _ = block_forward(x, p_bf16, num_heads=num_heads,
                                         low_rank=low_rank, approx_gelu=False)
    out_bf = jax.block_until_ready(out_bf)

    # f32 path for a tight numeric check against the pure-JAX reference.
    p_f32 = prepare_params(params, num_heads, low_rank, jnp.float32)
    out, scores, Lam = block_forward(x, p_f32, num_heads=num_heads,
                                     low_rank=low_rank, approx_gelu=False)
    out = jax.block_until_ready(out)
    escore = jax.block_until_ready(scores[0])
    rscore = jax.block_until_ready(scores[1])

    ref_out, ref_es, ref_rs = reference_block(x, params, num_heads, low_rank)
    np.testing.assert_allclose(np.asarray(out), np.asarray(ref_out),
                               rtol=1e-4, atol=1e-4)
    np.testing.assert_allclose(np.asarray(escore), np.asarray(ref_es),
                               rtol=1e-4, atol=1e-4)
    np.testing.assert_allclose(np.asarray(rscore), np.asarray(ref_rs),
                               rtol=1e-4, atol=1e-4)
    # bf16 path: loose check (numerics differ from the f32 reference by design)
    np.testing.assert_allclose(np.asarray(out_bf), np.asarray(ref_out),
                               rtol=1e-1, atol=1e-1)
    print("KERNEL_OK")
</pallas_src>

<mosaic_0001>
module attributes {stable_mosaic.version = 11 : i64} {
  func.func @_matmul_bias_resid_kernel(%arg0: i32, %arg1: i32, %arg2: memref<16x32xbf16, #tpu.memory_space<vmem>>, %arg3: memref<32x32xbf16, #tpu.memory_space<vmem>>, %arg4: memref<1x32xf32, #tpu.memory_space<vmem>>, %arg5: memref<16x32xf32, #tpu.memory_space<vmem>>, %arg6: memref<16x32xf32, #tpu.memory_space<vmem>>) attributes {dimension_semantics = [#tpu.dimension_semantics<parallel>, #tpu.dimension_semantics<arbitrary>], iteration_bounds = array<i64: 1, 1>, scalar_prefetch = 0 : i64, scratch_operands = 0 : i64, tpu.core_type = #tpu.core_type<tc>, window_params = [{transform_indices = @transform_0, window_bounds = array<i64: 16, 32>}, {transform_indices = @transform_1, window_bounds = array<i64: 32, 32>}, {pipeline_mode = #tpu.pipeline_mode<synchronous>, transform_indices = @transform_2, window_bounds = array<i64: 1, 32>}, {transform_indices = @transform_3, window_bounds = array<i64: 16, 32>}, {transform_indices = @transform_4, window_bounds = array<i64: 16, 32>}]} {
    %c0_i32 = arith.constant 0 : i32
    %0 = arith.cmpi eq, %arg1, %c0_i32 : i32
    %1 = arith.extui %0 : i1 to i32
    %c0_i32_0 = arith.constant 0 : i32
    %2 = arith.cmpi ne, %1, %c0_i32_0 : i32
    scf.if %2 {
      %cst_10 = arith.constant 0.000000e+00 : f32
      %12 = vector.broadcast %cst_10 : f32 to vector<16x32xf32>
      %c0_11 = arith.constant 0 : index
      %c0_12 = arith.constant 0 : index
      %13 = vector.load %arg6[%c0_11, %c0_12] : memref<16x32xf32, #tpu.memory_space<vmem>>, vector<16x32xf32>
      tpu.vector_store %arg6[%c0_11, %c0_12], %12 {strides = array<i32>} : memref<16x32xf32, #tpu.memory_space<vmem>>, vector<16x32xf32>,
    } else {
    }
    %c0 = arith.constant 0 : index
    %c0_1 = arith.constant 0 : index
    %3 = vector.load %arg6[%c0, %c0_1] : memref<16x32xf32, #tpu.memory_space<vmem>>, vector<16x32xf32>
    %c0_2 = arith.constant 0 : index
    %c0_3 = arith.constant 0 : index
    %4 = vector.load %arg2[%c0_2, %c0_3] : memref<16x32xbf16, #tpu.memory_space<vmem>>, vector<16x32xbf16>
    %c0_4 = arith.constant 0 : index
    %c0_5 = arith.constant 0 : index
    %5 = vector.load %arg3[%c0_4, %c0_5] : memref<32x32xbf16, #tpu.memory_space<vmem>>, vector<32x32xbf16>
    %cst = arith.constant dense<0.000000e+00> : vector<16x32xf32>
    %6 = tpu.matmul %4, %5, %cst {dimension_numbers = #tpu.dot_dimension_numbers<[1], [0], [0], [1], [0, 0, 1, 1], [], []>} : vector<16x32xbf16>, vector<32x32xbf16>, vector<16x32xf32> -> vector<16x32xf32>
    %7 = arith.addf %3, %6 : vector<16x32xf32>
    %c0_6 = arith.constant 0 : index
    %c0_7 = arith.constant 0 : index
    %8 = vector.load %arg6[%c0_6, %c0_7] : memref<16x32xf32, #tpu.memory_space<vmem>>, vector<16x32xf32>
    tpu.vector_store %arg6[%c0_6, %c0_7], %7 {strides = array<i32>} : memref<16x32xf32, #tpu.memory_space<vmem>>, vector<16x32xf32>,
    %c0_i32_8 = arith.constant 0 : i32
    %9 = arith.cmpi eq, %arg1, %c0_i32_8 : i32
    %10 = arith.extui %9 : i1 to i32
    %c0_i32_9 = arith.constant 0 : i32
    %11 = arith.cmpi ne, %10, %c0_i32_9 : i32
    scf.if %11 {
      %c0_10 = arith.constant 0 : index
      %c0_11 = arith.constant 0 : index
      %12 = vector.load %arg6[%c0_10, %c0_11] : memref<16x32xf32, #tpu.memory_space<vmem>>, vector<16x32xf32>
      %c0_12 = arith.constant 0 : index
      %c0_13 = arith.constant 0 : index
      %13 = vector.load %arg4[%c0_12, %c0_13] : memref<1x32xf32, #tpu.memory_space<vmem>>, vector<1x32xf32>
      %c0_14 = arith.constant 0 : index
      %c0_15 = arith.constant 0 : index
      %14 = vector.load %arg5[%c0_14, %c0_15] : memref<16x32xf32, #tpu.memory_space<vmem>>, vector<16x32xf32>
      %15 = vector.broadcast %13 : vector<1x32xf32> to vector<16x32xf32>
      %16 = arith.addf %15, %14 : vector<16x32xf32>
      %17 = arith.addf %12, %16 : vector<16x32xf32>
      %c0_16 = arith.constant 0 : index
      %c0_17 = arith.constant 0 : index
      %18 = vector.load %arg6[%c0_16, %c0_17] : memref<16x32xf32, #tpu.memory_space<vmem>>, vector<16x32xf32>
      tpu.vector_store %arg6[%c0_16, %c0_17], %17 {strides = array<i32>} : memref<16x32xf32, #tpu.memory_space<vmem>>, vector<16x32xf32>,
    } else {
    }
    return
  }
  func.func @transform_0(%arg0: i32, %arg1: i32) -> (i32, i32) {
    %c0_i32 = arith.constant 0 : i32
    return %arg0, %arg1 : i32, i32
  }
  func.func @transform_1(%arg0: i32, %arg1: i32) -> (i32, i32) {
    %c0_i32 = arith.constant 0 : i32
    %c0_i32_0 = arith.constant 0 : i32
    return %arg1, %c0_i32 : i32, i32
  }
  func.func @transform_2(%arg0: i32, %arg1: i32) -> (i32, i32) {
    %c0_i32 = arith.constant 0 : i32
    %c0_i32_0 = arith.constant 0 : i32
    %c0_i32_1 = arith.constant 0 : i32
    return %c0_i32, %c0_i32_0 : i32, i32
  }
  func.func @transform_3(%arg0: i32, %arg1: i32) -> (i32, i32) {
    %c0_i32 = arith.constant 0 : i32
    %c0_i32_0 = arith.constant 0 : i32
    return %arg0, %c0_i32 : i32, i32
  }
  func.func @transform_4(%arg0: i32, %arg1: i32) -> (i32, i32) {
    %c0_i32 = arith.constant 0 : i32
    %c0_i32_0 = arith.constant 0 : i32
    return %arg0, %c0_i32 : i32, i32
  }
}

module attributes {stable_mosaic.version = 11 : i64} {
  func.func @_ln_matmul_kernel(%arg0: i32, %arg1: memref<16x32xf32, #tpu.memory_space<vmem>>, %arg2: memref<1x32xf32, #tpu.memory_space<vmem>>, %arg3: memref<1x32xf32, #tpu.memory_space<vmem>>, %arg4: memref<32x64xbf16, #tpu.memory_space<vmem>>, %arg5: memref<16x64xbf16, #tpu.memory_space<vmem>>, %arg6: memref<16x32xbf16, #tpu.memory_space<vmem>>) attributes {dimension_semantics = [#tpu.dimension_semantics<parallel>], iteration_bounds = array<i64: 1>, scalar_prefetch = 0 : i64, scratch_operands = 0 : i64, tpu.core_type = #tpu.core_type<tc>, window_params = [{transform_indices = @transform_0, window_bounds = array<i64: 16, 32>}, {pipeline_mode = #tpu.pipeline_mode<synchronous>, transform_indices = @transform_1, window_bounds = array<i64: 1, 32>}, {pipeline_mode = #tpu.pipeline_mode<synchronous>, transform_indices = @transform_2, window_bounds = array<i64: 1, 32>}, {pipeline_mode = #tpu.pipeline_mode<synchronous>, transform_indices = @transform_3, window_bounds = array<i64: 32, 64>}, {transform_indices = @transform_4, window_bounds = array<i64: 16, 64>}, {transform_indices = @transform_5, window_bounds = array<i64: 16, 32>}]} {
    %c0 = arith.constant 0 : index
    %c0_0 = arith.constant 0 : index
    %0 = vector.load %arg1[%c0, %c0_0] : memref<16x32xf32, #tpu.memory_space<vmem>>, vector<16x32xf32>
    %cst = arith.constant dense<0.000000e+00> : vector<16xf32>
    %1 = vector.multi_reduction <add>, %0, %cst [1] : vector<16x32xf32> to vector<16xf32>
    %2 = vector.shape_cast %1 : vector<16xf32> to vector<16x1xf32>
    %cst_1 = arith.constant 3.200000e+01 : f32
    %3 = vector.broadcast %cst_1 : f32 to vector<16x1xf32>
    %4 = arith.divf %2, %3 : vector<16x1xf32>
    %5 = vector.broadcast %4 : vector<16x1xf32> to vector<16x32xf32>
    %6 = arith.subf %0, %5 : vector<16x32xf32>
    %7 = arith.mulf %6, %6 : vector<16x32xf32>
    %cst_2 = arith.constant dense<0.000000e+00> : vector<16xf32>
    %8 = vector.multi_reduction <add>, %7, %cst_2 [1] : vector<16x32xf32> to vector<16xf32>
    %9 = vector.shape_cast %8 : vector<16xf32> to vector<16x1xf32>
    %cst_3 = arith.constant 3.200000e+01 : f32
    %10 = vector.broadcast %cst_3 : f32 to vector<16x1xf32>
    %11 = arith.divf %9, %10 : vector<16x1xf32>
    %cst_4 = arith.constant 9.99999974E-6 : f32
    %12 = vector.broadcast %cst_4 : f32 to vector<16x1xf32>
    %13 = arith.addf %11, %12 : vector<16x1xf32>
    %14 = math.rsqrt %13 : vector<16x1xf32>
    %15 = vector.broadcast %14 : vector<16x1xf32> to vector<16x32xf32>
    %16 = arith.mulf %6, %15 : vector<16x32xf32>
    %c0_5 = arith.constant 0 : index
    %c0_6 = arith.constant 0 : index
    %17 = vector.load %arg2[%c0_5, %c0_6] : memref<1x32xf32, #tpu.memory_space<vmem>>, vector<1x32xf32>
    %18 = vector.broadcast %17 : vector<1x32xf32> to vector<16x32xf32>
    %19 = arith.mulf %16, %18 : vector<16x32xf32>
    %c0_7 = arith.constant 0 : index
    %c0_8 = arith.constant 0 : index
    %20 = vector.load %arg3[%c0_7, %c0_8] : memref<1x32xf32, #tpu.memory_space<vmem>>, vector<1x32xf32>
    %21 = vector.broadcast %20 : vector<1x32xf32> to vector<16x32xf32>
    %22 = arith.addf %19, %21 : vector<16x32xf32>
    %23 = arith.truncf %22 : vector<16x32xf32> to vector<16x32xbf16>
    %c0_9 = arith.constant 0 : index
    %c0_10 = arith.constant 0 : index
    %24 = vector.load %arg6[%c0_9, %c0_10] : memref<16x32xbf16, #tpu.memory_space<vmem>>, vector<16x32xbf16>
    tpu.vector_store %arg6[%c0_9, %c0_10], %23 {strides = array<i32>} : memref<16x32xbf16, #tpu.memory_space<vmem>>, vector<16x32xbf16>,
    %25 = arith.truncf %22 : vector<16x32xf32> to vector<16x32xbf16>
    %c0_11 = arith.constant 0 : index
    %c0_12 = arith.constant 0 : index
    %26 = vector.load %arg4[%c0_11, %c0_12] : memref<32x64xbf16, #tpu.memory_space<vmem>>, vector<32x64xbf16>
    %cst_13 = arith.constant dense<0.000000e+00> : vector<16x64xf32>
    %27 = tpu.matmul %25, %26, %cst_13 {dimension_numbers = #tpu.dot_dimension_numbers<[1], [0], [0], [1], [0, 0, 1, 1], [], []>} : vector<16x32xbf16>, vector<32x64xbf16>, vector<16x64xf32> -> vector<16x64xf32>
    %28 = arith.truncf %27 : vector<16x64xf32> to vector<16x64xbf16>
    %c0_14 = arith.constant 0 : index
    %c0_15 = arith.constant 0 : index
    %29 = vector.load %arg5[%c0_14, %c0_15] : memref<16x64xbf16, #tpu.memory_space<vmem>>, vector<16x64xbf16>
    tpu.vector_store %arg5[%c0_14, %c0_15], %28 {strides = array<i32>} : memref<16x64xbf16, #tpu.memory_space<vmem>>, vector<16x64xbf16>,
    return
  }
  func.func @transform_0(%arg0: i32) -> (i32, i32) {
    %c0_i32 = arith.constant 0 : i32
    %c0_i32_0 = arith.constant 0 : i32
    return %arg0, %c0_i32 : i32, i32
  }
  func.func @transform_1(%arg0: i32) -> (i32, i32) {
    %c0_i32 = arith.constant 0 : i32
    %c0_i32_0 = arith.constant 0 : i32
    %c0_i32_1 = arith.constant 0 : i32
    return %c0_i32, %c0_i32_0 : i32, i32
  }
  func.func @transform_2(%arg0: i32) -> (i32, i32) {
    %c0_i32 = arith.constant 0 : i32
    %c0_i32_0 = arith.constant 0 : i32
    %c0_i32_1 = arith.constant 0 : i32
    return %c0_i32, %c0_i32_0 : i32, i32
  }
  func.func @transform_3(%arg0: i32) -> (i32, i32) {
    %c0_i32 = arith.constant 0 : i32
    %c0_i32_0 = arith.constant 0 : i32
    %c0_i32_1 = arith.constant 0 : i32
    return %c0_i32, %c0_i32_0 : i32, i32
  }
  func.func @transform_4(%arg0: i32) -> (i32, i32) {
    %c0_i32 = arith.constant 0 : i32
    %c0_i32_0 = arith.constant 0 : i32
    return %arg0, %c0_i32 : i32, i32
  }
  func.func @transform_5(%arg0: i32) -> (i32, i32) {
    %c0_i32 = arith.constant 0 : i32
    %c0_i32_0 = arith.constant 0 : i32
    return %arg0, %c0_i32 : i32, i32
  }
}

module attributes {stable_mosaic.version = 11 : i64} {
  func.func @_primal_attn_kernel(%arg0: i32, %arg1: memref<1x8x64xbf16, #tpu.memory_space<vmem>>, %arg2: memref<1x8x32xbf16, #tpu.memory_space<vmem>>, %arg3: memref<8x32xbf16, #tpu.memory_space<vmem>>, %arg4: memref<8x32xbf16, #tpu.memory_space<vmem>>, %arg5: memref<32x32xf32, #tpu.memory_space<vmem>>, %arg6: memref<32x32xbf16, #tpu.memory_space<vmem>>, %arg7: memref<32x32xbf16, #tpu.memory_space<vmem>>, %arg8: memref<1x32xf32, #tpu.memory_space<vmem>>, %arg9: memref<1x8x32xbf16, #tpu.memory_space<vmem>>, %arg10: memref<1x8x32xf32, #tpu.memory_space<vmem>>, %arg11: memref<1x8x32xf32, #tpu.memory_space<vmem>>, %arg12: memref<8x32xbf16, #tpu.memory_space<vmem>>, %arg13: memref<8x32xbf16, #tpu.memory_space<vmem>>) attributes {dimension_semantics = [#tpu.dimension_semantics<parallel>], iteration_bounds = array<i64: 2>, scalar_prefetch = 0 : i64, scratch_operands = 2 : i64, tpu.core_type = #tpu.core_type<tc>, window_params = [{transform_indices = @transform_0, window_bounds = array<i64: 1, 8, 64>}, {transform_indices = @transform_1, window_bounds = array<i64: 1, 8, 32>}, {pipeline_mode = #tpu.pipeline_mode<synchronous>, transform_indices = @transform_2, window_bounds = array<i64: 8, 32>}, {pipeline_mode = #tpu.pipeline_mode<synchronous>, transform_indices = @transform_3, window_bounds = array<i64: 8, 32>}, {pipeline_mode = #tpu.pipeline_mode<synchronous>, transform_indices = @transform_4, window_bounds = array<i64: 32, 32>}, {pipeline_mode = #tpu.pipeline_mode<synchronous>, transform_indices = @transform_5, window_bounds = array<i64: 32, 32>}, {pipeline_mode = #tpu.pipeline_mode<synchronous>, transform_indices = @transform_6, window_bounds = array<i64: 32, 32>}, {pipeline_mode = #tpu.pipeline_mode<synchronous>, transform_indices = @transform_7, window_bounds = array<i64: 1, 32>}, {transform_indices = @transform_8, window_bounds = array<i64: 1, 8, 32>}, {transform_indices = @transform_9, window_bounds = array<i64: 1, 8, 32>}, {transform_indices = @transform_10, window_bounds = array<i64: 1, 8, 32>}]} {
    %c0 = arith.constant 0 : index
    %c0_0 = arith.constant 0 : index
    %c0_1 = arith.constant 0 : index
    %0 = vector.load %arg2[%c0, %c0_0, %c0_1] : memref<1x8x32xbf16, #tpu.memory_space<vmem>>, vector<1x8x32xbf16>
    %1 = vector.shape_cast %0 : vector<1x8x32xbf16> to vector<8x32xbf16>
    %c0_2 = arith.constant 0 : index
    %c0_3 = arith.constant 0 : index
    %2 = vector.load %arg3[%c0_2, %c0_3] : memref<8x32xbf16, #tpu.memory_space<vmem>>, vector<8x32xbf16>
    %cst = arith.constant dense<0.000000e+00> : vector<32x32xf32>
    %3 = tpu.matmul %1, %2, %cst {dimension_numbers = #tpu.dot_dimension_numbers<[0], [0], [1], [1], [0, 1, 1, 1], [], []>} : vector<8x32xbf16>, vector<8x32xbf16>, vector<32x32xf32> -> vector<32x32xf32>
    %c0_4 = arith.constant 0 : index
    %c0_5 = arith.constant 0 : index
    %4 = vector.load %arg5[%c0_4, %c0_5] : memref<32x32xf32, #tpu.memory_space<vmem>>, vector<32x32xf32>
    %5 = arith.mulf %3, %4 : vector<32x32xf32>
    %c0_6 = arith.constant 0 : index
    %c0_7 = arith.constant 0 : index
    %6 = vector.load %arg4[%c0_6, %c0_7] : memref<8x32xbf16, #tpu.memory_space<vmem>>, vector<8x32xbf16>
    %cst_8 = arith.constant dense<0.000000e+00> : vector<32x32xf32>
    %7 = tpu.matmul %1, %6, %cst_8 {dimension_numbers = #tpu.dot_dimension_numbers<[0], [0], [1], [1], [0, 1, 1, 1], [], []>} : vector<8x32xbf16>, vector<8x32xbf16>, vector<32x32xf32> -> vector<32x32xf32>
    %c0_9 = arith.constant 0 : index
    %c0_10 = arith.constant 0 : index
    %8 = vector.load %arg5[%c0_9, %c0_10] : memref<32x32xf32, #tpu.memory_space<vmem>>, vector<32x32xf32>
    %9 = arith.mulf %7, %8 : vector<32x32xf32>
    %c0_11 = arith.constant 0 : index
    %c0_12 = arith.constant 0 : index
    %c0_13 = arith.constant 0 : index
    %10 = vector.load %arg1[%c0_11, %c0_12, %c0_13] : memref<1x8x64xbf16, #tpu.memory_space<vmem>>, vector<1x8x64xbf16>
    %11 = vector.shape_cast %10 : vector<1x8x64xbf16> to vector<8x64xbf16>
    %12 = vector.extract_strided_slice %11 {offsets = [0, 0], sizes = [8, 8], strides = [1, 1]} : vector<8x64xbf16> to vector<8x8xbf16>
    %13 = arith.extf %12 : vector<8x8xbf16> to vector<8x8xf32>
    %14 = vector.extract_strided_slice %11 {offsets = [0, 32], sizes = [8, 8], strides = [1, 1]} : vector<8x64xbf16> to vector<8x8xbf16>
    %15 = arith.extf %14 : vector<8x8xbf16> to vector<8x8xf32>
    %16 = arith.mulf %13, %13 : vector<8x8xf32>
    %cst_14 = arith.constant dense<0.000000e+00> : vector<8xf32>
    %17 = vector.multi_reduction <add>, %16, %cst_14 [1] : vector<8x8xf32> to vector<8xf32>
    %18 = vector.shape_cast %17 : vector<8xf32> to vector<8x1xf32>
    %cst_15 = arith.constant 1.000000e-24 : f32
    %19 = vector.broadcast %cst_15 : f32 to vector<8x1xf32>
    %20 = arith.maximumf %18, %19 : vector<8x1xf32>
    %21 = arith.mulf %15, %15 : vector<8x8xf32>
    %cst_16 = arith.constant dense<0.000000e+00> : vector<8xf32>
    %22 = vector.multi_reduction <add>, %21, %cst_16 [1] : vector<8x8xf32> to vector<8xf32>
    %23 = vector.shape_cast %22 : vector<8xf32> to vector<8x1xf32>
    %cst_17 = arith.constant 1.000000e-24 : f32
    %24 = vector.broadcast %cst_17 : f32 to vector<8x1xf32>
    %25 = arith.maximumf %23, %24 : vector<8x1xf32>
    %26 = math.rsqrt %20 : vector<8x1xf32>
    %27 = vector.broadcast %26 : vector<8x1xf32> to vector<8x8xf32>
    %28 = arith.mulf %13, %27 : vector<8x8xf32>
    %29 = arith.truncf %28 : vector<8x8xf32> to vector<8x8xbf16>
    %c0_18 = arith.constant 0 : index
    %c0_19 = arith.constant 0 : index
    %30 = vector.load %arg12[%c0_18, %c0_19] : memref<8x32xbf16, #tpu.memory_space<vmem>>, vector<8x8xbf16>
    tpu.vector_store %arg12[%c0_18, %c0_19], %29 {strides = array<i32>} : memref<8x32xbf16, #tpu.memory_space<vmem>>, vector<8x8xbf16>,
    %31 = math.rsqrt %25 : vector<8x1xf32>
    %32 = vector.broadcast %31 : vector<8x1xf32> to vector<8x8xf32>
    %33 = arith.mulf %15, %32 : vector<8x8xf32>
    %34 = arith.truncf %33 : vector<8x8xf32> to vector<8x8xbf16>
    %c0_20 = arith.constant 0 : index
    %c0_21 = arith.constant 0 : index
    %35 = vector.load %arg13[%c0_20, %c0_21] : memref<8x32xbf16, #tpu.memory_space<vmem>>, vector<8x8xbf16>
    tpu.vector_store %arg13[%c0_20, %c0_21], %34 {strides = array<i32>} : memref<8x32xbf16, #tpu.memory_space<vmem>>, vector<8x8xbf16>,
    %36 = vector.extract_strided_slice %11 {offsets = [0, 8], sizes = [8, 8], strides = [1, 1]} : vector<8x64xbf16> to vector<8x8xbf16>
    %37 = arith.extf %36 : vector<8x8xbf16> to vector<8x8xf32>
    %38 = vector.extract_strided_slice %11 {offsets = [0, 40], sizes = [8, 8], strides = [1, 1]} : vector<8x64xbf16> to vector<8x8xbf16>
    %39 = arith.extf %38 : vector<8x8xbf16> to vector<8x8xf32>
    %40 = arith.mulf %37, %37 : vector<8x8xf32>
    %cst_22 = arith.constant dense<0.000000e+00> : vector<8xf32>
    %41 = vector.multi_reduction <add>, %40, %cst_22 [1] : vector<8x8xf32> to vector<8xf32>
    %42 = vector.shape_cast %41 : vector<8xf32> to vector<8x1xf32>
    %cst_23 = arith.constant 1.000000e-24 : f32
    %43 = vector.broadcast %cst_23 : f32 to vector<8x1xf32>
    %44 = arith.maximumf %42, %43 : vector<8x1xf32>
    %45 = arith.mulf %39, %39 : vector<8x8xf32>
    %cst_24 = arith.constant dense<0.000000e+00> : vector<8xf32>
    %46 = vector.multi_reduction <add>, %45, %cst_24 [1] : vector<8x8xf32> to vector<8xf32>
    %47 = vector.shape_cast %46 : vector<8xf32> to vector<8x1xf32>
    %cst_25 = arith.constant 1.000000e-24 : f32
    %48 = vector.broadcast %cst_25 : f32 to vector<8x1xf32>
    %49 = arith.maximumf %47, %48 : vector<8x1xf32>
    %50 = math.rsqrt %44 : vector<8x1xf32>
    %51 = vector.broadcast %50 : vector<8x1xf32> to vector<8x8xf32>
    %52 = arith.mulf %37, %51 : vector<8x8xf32>
    %53 = arith.truncf %52 : vector<8x8xf32> to vector<8x8xbf16>
    %c0_26 = arith.constant 0 : index
    %c8 = arith.constant 8 : index
    %54 = vector.load %arg12[%c0_26, %c8] : memref<8x32xbf16, #tpu.memory_space<vmem>>, vector<8x8xbf16>
    tpu.vector_store %arg12[%c0_26, %c8], %53 {strides = array<i32>} : memref<8x32xbf16, #tpu.memory_space<vmem>>, vector<8x8xbf16>,
    %55 = math.rsqrt %49 : vector<8x1xf32>
    %56 = vector.broadcast %55 : vector<8x1xf32> to vector<8x8xf32>
    %57 = arith.mulf %39, %56 : vector<8x8xf32>
    %58 = arith.truncf %57 : vector<8x8xf32> to vector<8x8xbf16>
    %c0_27 = arith.constant 0 : index
    %c8_28 = arith.constant 8 : index
    %59 = vector.load %arg13[%c0_27, %c8_28] : memref<8x32xbf16, #tpu.memory_space<vmem>>, vector<8x8xbf16>
    tpu.vector_store %arg13[%c0_27, %c8_28], %58 {strides = array<i32>} : memref<8x32xbf16, #tpu.memory_space<vmem>>, vector<8x8xbf16>,
    %60 = vector.extract_strided_slice %11 {offsets = [0, 16], sizes = [8, 8], strides = [1, 1]} : vector<8x64xbf16> to vector<8x8xbf16>
    %61 = arith.extf %60 : vector<8x8xbf16> to vector<8x8xf32>
    %62 = vector.extract_strided_slice %11 {offsets = [0, 48], sizes = [8, 8], strides = [1, 1]} : vector<8x64xbf16> to vector<8x8xbf16>
    %63 = arith.extf %62 : vector<8x8xbf16> to vector<8x8xf32>
    %64 = arith.mulf %61, %61 : vector<8x8xf32>
    %cst_29 = arith.constant dense<0.000000e+00> : vector<8xf32>
    %65 = vector.multi_reduction <add>, %64, %cst_29 [1] : vector<8x8xf32> to vector<8xf32>
    %66 = vector.shape_cast %65 : vector<8xf32> to vector<8x1xf32>
    %cst_30 = arith.constant 1.000000e-24 : f32
    %67 = vector.broadcast %cst_30 : f32 to vector<8x1xf32>
    %68 = arith.maximumf %66, %67 : vector<8x1xf32>
    %69 = arith.mulf %63, %63 : vector<8x8xf32>
    %cst_31 = arith.constant dense<0.000000e+00> : vector<8xf32>
    %70 = vector.multi_reduction <add>, %69, %cst_31 [1] : vector<8x8xf32> to vector<8xf32>
    %71 = vector.shape_cast %70 : vector<8xf32> to vector<8x1xf32>
    %cst_32 = arith.constant 1.000000e-24 : f32
    %72 = vector.broadcast %cst_32 : f32 to vector<8x1xf32>
    %73 = arith.maximumf %71, %72 : vector<8x1xf32>
    %74 = math.rsqrt %68 : vector<8x1xf32>
    %75 = vector.broadcast %74 : vector<8x1xf32> to vector<8x8xf32>
    %76 = arith.mulf %61, %75 : vector<8x8xf32>
    %77 = arith.truncf %76 : vector<8x8xf32> to vector<8x8xbf16>
    %c0_33 = arith.constant 0 : index
    %c16 = arith.constant 16 : index
    %78 = vector.load %arg12[%c0_33, %c16] : memref<8x32xbf16, #tpu.memory_space<vmem>>, vector<8x8xbf16>
    tpu.vector_store %arg12[%c0_33, %c16], %77 {strides = array<i32>} : memref<8x32xbf16, #tpu.memory_space<vmem>>, vector<8x8xbf16>,
    %79 = math.rsqrt %73 : vector<8x1xf32>
    %80 = vector.broadcast %79 : vector<8x1xf32> to vector<8x8xf32>
    %81 = arith.mulf %63, %80 : vector<8x8xf32>
    %82 = arith.truncf %81 : vector<8x8xf32> to vector<8x8xbf16>
    %c0_34 = arith.constant 0 : index
    %c16_35 = arith.constant 16 : index
    %83 = vector.load %arg13[%c0_34, %c16_35] : memref<8x32xbf16, #tpu.memory_space<vmem>>, vector<8x8xbf16>
    tpu.vector_store %arg13[%c0_34, %c16_35], %82 {strides = array<i32>} : memref<8x32xbf16, #tpu.memory_space<vmem>>, vector<8x8xbf16>,
    %84 = vector.extract_strided_slice %11 {offsets = [0, 24], sizes = [8, 8], strides = [1, 1]} : vector<8x64xbf16> to vector<8x8xbf16>
    %85 = arith.extf %84 : vector<8x8xbf16> to vector<8x8xf32>
    %86 = vector.extract_strided_slice %11 {offsets = [0, 56], sizes = [8, 8], strides = [1, 1]} : vector<8x64xbf16> to vector<8x8xbf16>
    %87 = arith.extf %86 : vector<8x8xbf16> to vector<8x8xf32>
    %88 = arith.mulf %85, %85 : vector<8x8xf32>
    %cst_36 = arith.constant dense<0.000000e+00> : vector<8xf32>
    %89 = vector.multi_reduction <add>, %88, %cst_36 [1] : vector<8x8xf32> to vector<8xf32>
    %90 = vector.shape_cast %89 : vector<8xf32> to vector<8x1xf32>
    %cst_37 = arith.constant 1.000000e-24 : f32
    %91 = vector.broadcast %cst_37 : f32 to vector<8x1xf32>
    %92 = arith.maximumf %90, %91 : vector<8x1xf32>
    %93 = arith.mulf %87, %87 : vector<8x8xf32>
    %cst_38 = arith.constant dense<0.000000e+00> : vector<8xf32>
    %94 = vector.multi_reduction <add>, %93, %cst_38 [1] : vector<8x8xf32> to vector<8xf32>
    %95 = vector.shape_cast %94 : vector<8xf32> to vector<8x1xf32>
    %cst_39 = arith.constant 1.000000e-24 : f32
    %96 = vector.broadcast %cst_39 : f32 to vector<8x1xf32>
    %97 = arith.maximumf %95, %96 : vector<8x1xf32>
    %98 = math.rsqrt %92 : vector<8x1xf32>
    %99 = vector.broadcast %98 : vector<8x1xf32> to vector<8x8xf32>
    %100 = arith.mulf %85, %99 : vector<8x8xf32>
    %101 = arith.truncf %100 : vector<8x8xf32> to vector<8x8xbf16>
    %c0_40 = arith.constant 0 : index
    %c24 = arith.constant 24 : index
    %102 = vector.load %arg12[%c0_40, %c24] : memref<8x32xbf16, #tpu.memory_space<vmem>>, vector<8x8xbf16>
    tpu.vector_store %arg12[%c0_40, %c24], %101 {strides = array<i32>} : memref<8x32xbf16, #tpu.memory_space<vmem>>, vector<8x8xbf16>,
    %103 = math.rsqrt %97 : vector<8x1xf32>
    %104 = vector.broadcast %103 : vector<8x1xf32> to vector<8x8xf32>
    %105 = arith.mulf %87, %104 : vector<8x8xf32>
    %106 = arith.truncf %105 : vector<8x8xf32> to vector<8x8xbf16>
    %c0_41 = arith.constant 0 : index
    %c24_42 = arith.constant 24 : index
    %107 = vector.load %arg13[%c0_41, %c24_42] : memref<8x32xbf16, #tpu.memory_space<vmem>>, vector<8x8xbf16>
    tpu.vector_store %arg13[%c0_41, %c24_42], %106 {strides = array<i32>} : memref<8x32xbf16, #tpu.memory_space<vmem>>, vector<8x8xbf16>,
    %c0_43 = arith.constant 0 : index
    %c0_44 = arith.constant 0 : index
    %108 = vector.load %arg12[%c0_43, %c0_44] : memref<8x32xbf16, #tpu.memory_space<vmem>>, vector<8x32xbf16>
    %c0_45 = arith.constant 0 : index
    %c0_46 = arith.constant 0 : index
    %109 = vector.load %arg13[%c0_45, %c0_46] : memref<8x32xbf16, #tpu.memory_space<vmem>>, vector<8x32xbf16>
    %110 = arith.truncf %5 : vector<32x32xf32> to vector<32x32xbf16>
    %cst_47 = arith.constant dense<0.000000e+00> : vector<8x32xf32>
    %111 = tpu.matmul %108, %110, %cst_47 {dimension_numbers = #tpu.dot_dimension_numbers<[1], [0], [0], [1], [0, 0, 1, 1], [], []>} : vector<8x32xbf16>, vector<32x32xbf16>, vector<8x32xf32> -> vector<8x32xf32>
    %112 = arith.truncf %9 : vector<32x32xf32> to vector<32x32xbf16>
    %cst_48 = arith.constant dense<0.000000e+00> : vector<8x32xf32>
    %113 = tpu.matmul %109, %112, %cst_48 {dimension_numbers = #tpu.dot_dimension_numbers<[1], [0], [0], [1], [0, 0, 1, 1], [], []>} : vector<8x32xbf16>, vector<32x32xbf16>, vector<8x32xf32> -> vector<8x32xf32>
    %c0_49 = arith.constant 0 : index
    %c0_50 = arith.constant 0 : index
    %c0_51 = arith.constant 0 : index
    %114 = vector.load %arg10[%c0_49, %c0_50, %c0_51] : memref<1x8x32xf32, #tpu.memory_space<vmem>>, vector<1x8x32xf32>
    %115 = vector.shape_cast %114 : vector<1x8x32xf32> to vector<8x32xf32>
    %116 = vector.shape_cast %111 : vector<8x32xf32> to vector<1x8x32xf32>
    tpu.vector_store %arg10[%c0_49, %c0_50, %c0_51], %116 {strides = array<i32>} : memref<1x8x32xf32, #tpu.memory_space<vmem>>, vector<1x8x32xf32>,
    %c0_52 = arith.constant 0 : index
    %c0_53 = arith.constant 0 : index
    %c0_54 = arith.constant 0 : index
    %117 = vector.load %arg11[%c0_52, %c0_53, %c0_54] : memref<1x8x32xf32, #tpu.memory_space<vmem>>, vector<1x8x32xf32>
    %118 = vector.shape_cast %117 : vector<1x8x32xf32> to vector<8x32xf32>
    %119 = vector.shape_cast %113 : vector<8x32xf32> to vector<1x8x32xf32>
    tpu.vector_store %arg11[%c0_52, %c0_53, %c0_54], %119 {strides = array<i32>} : memref<1x8x32xf32, #tpu.memory_space<vmem>>, vector<1x8x32xf32>,
    %120 = arith.truncf %111 : vector<8x32xf32> to vector<8x32xbf16>
    %c0_55 = arith.constant 0 : index
    %c0_56 = arith.constant 0 : index
    %121 = vector.load %arg6[%c0_55, %c0_56] : memref<32x32xbf16, #tpu.memory_space<vmem>>, vector<32x32xbf16>
    %cst_57 = arith.constant dense<0.000000e+00> : vector<8x32xf32>
    %122 = tpu.matmul %120, %121, %cst_57 {dimension_numbers = #tpu.dot_dimension_numbers<[1], [0], [0], [1], [0, 0, 1, 1], [], []>} : vector<8x32xbf16>, vector<32x32xbf16>, vector<8x32xf32> -> vector<8x32xf32>
    %123 = arith.truncf %113 : vector<8x32xf32> to vector<8x32xbf16>
    %c0_58 = arith.constant 0 : index
    %c0_59 = arith.constant 0 : index
    %124 = vector.load %arg7[%c0_58, %c0_59] : memref<32x32xbf16, #tpu.memory_space<vmem>>, vector<32x32xbf16>
    %cst_60 = arith.constant dense<0.000000e+00> : vector<8x32xf32>
    %125 = tpu.matmul %123, %124, %cst_60 {dimension_numbers = #tpu.dot_dimension_numbers<[1], [0], [0], [1], [0, 0, 1, 1], [], []>} : vector<8x32xbf16>, vector<32x32xbf16>, vector<8x32xf32> -> vector<8x32xf32>
    %126 = arith.addf %122, %125 : vector<8x32xf32>
    %c0_61 = arith.constant 0 : index
    %c0_62 = arith.constant 0 : index
    %127 = vector.load %arg8[%c0_61, %c0_62] : memref<1x32xf32, #tpu.memory_space<vmem>>, vector<1x32xf32>
    %128 = vector.broadcast %127 : vector<1x32xf32> to vector<8x32xf32>
    %129 = arith.addf %126, %128 : vector<8x32xf32>
    %130 = arith.truncf %129 : vector<8x32xf32> to vector<8x32xbf16>
    %c0_63 = arith.constant 0 : index
    %c0_64 = arith.constant 0 : index
    %c0_65 = arith.constant 0 : index
    %131 = vector.load %arg9[%c0_63, %c0_64, %c0_65] : memref<1x8x32xbf16, #tpu.memory_space<vmem>>, vector<1x8x32xbf16>
    %132 = vector.shape_cast %131 : vector<1x8x32xbf16> to vector<8x32xbf16>
    %133 = vector.shape_cast %130 : vector<8x32xbf16> to vector<1x8x32xbf16>
    tpu.vector_store %arg9[%c0_63, %c0_64, %c0_65], %133 {strides = array<i32>} : memref<1x8x32xbf16, #tpu.memory_space<vmem>>, vector<1x8x32xbf16>,
    return
  }
  func.func @transform_0(%arg0: i32) -> (i32, i32, i32) {
    %c0_i32 = arith.constant 0 : i32
    %c0_i32_0 = arith.constant 0 : i32
    %c0_i32_1 = arith.constant 0 : i32
    return %arg0, %c0_i32, %c0_i32_0 : i32, i32, i32
  }
  func.func @transform_1(%arg0: i32) -> (i32, i32, i32) {
    %c0_i32 = arith.constant 0 : i32
    %c0_i32_0 = arith.constant 0 : i32
    %c0_i32_1 = arith.constant 0 : i32
    return %arg0, %c0_i32, %c0_i32_0 : i32, i32, i32
  }
  func.func @transform_2(%arg0: i32) -> (i32, i32) {
    %c0_i32 = arith.constant 0 : i32
    %c0_i32_0 = arith.constant 0 : i32
    %c0_i32_1 = arith.constant 0 : i32
    return %c0_i32, %c0_i32_0 : i32, i32
  }
  func.func @transform_3(%arg0: i32) -> (i32, i32) {
    %c0_i32 = arith.constant 0 : i32
    %c0_i32_0 = arith.constant 0 : i32
    %c0_i32_1 = arith.constant 0 : i32
    return %c0_i32, %c0_i32_0 : i32, i32
  }
  func.func @transform_4(%arg0: i32) -> (i32, i32) {
    %c0_i32 = arith.constant 0 : i32
    %c0_i32_0 = arith.constant 0 : i32
    %c0_i32_1 = arith.constant 0 : i32
    return %c0_i32, %c0_i32_0 : i32, i32
  }
  func.func @transform_5(%arg0: i32) -> (i32, i32) {
    %c0_i32 = arith.constant 0 : i32
    %c0_i32_0 = arith.constant 0 : i32
    %c0_i32_1 = arith.constant 0 : i32
    return %c0_i32, %c0_i32_0 : i32, i32
  }
  func.func @transform_6(%arg0: i32) -> (i32, i32) {
    %c0_i32 = arith.constant 0 : i32
    %c0_i32_0 = arith.constant 0 : i32
    %c0_i32_1 = arith.constant 0 : i32
    return %c0_i32, %c0_i32_0 : i32, i32
  }
  func.func @transform_7(%arg0: i32) -> (i32, i32) {
    %c0_i32 = arith.constant 0 : i32
    %c0_i32_0 = arith.constant 0 : i32
    %c0_i32_1 = arith.constant 0 : i32
    return %c0_i32, %c0_i32_0 : i32, i32
  }
  func.func @transform_8(%arg0: i32) -> (i32, i32, i32) {
    %c0_i32 = arith.constant 0 : i32
    %c0_i32_0 = arith.constant 0 : i32
    %c0_i32_1 = arith.constant 0 : i32
    return %arg0, %c0_i32, %c0_i32_0 : i32, i32, i32
  }
  func.func @transform_9(%arg0: i32) -> (i32, i32, i32) {
    %c0_i32 = arith.constant 0 : i32
    %c0_i32_0 = arith.constant 0 : i32
    %c0_i32_1 = arith.constant 0 : i32
    return %arg0, %c0_i32, %c0_i32_0 : i32, i32, i32
  }
  func.func @transform_10(%arg0: i32) -> (i32, i32, i32) {
    %c0_i32 = arith.constant 0 : i32
    %c0_i32_0 = arith.constant 0 : i32
    %c0_i32_1 = arith.constant 0 : i32
    return %arg0, %c0_i32, %c0_i32_0 : i32, i32, i32
  }
}

module attributes {stable_mosaic.version = 11 : i64} {
  func.func @_ln_matmul_bias_gelu_kernel(%arg0: i32, %arg1: i32, %arg2: memref<16x32xf32, #tpu.memory_space<vmem>>, %arg3: memref<1x32xf32, #tpu.memory_space<vmem>>, %arg4: memref<1x32xf32, #tpu.memory_space<vmem>>, %arg5: memref<32x128xbf16, #tpu.memory_space<vmem>>, %arg6: memref<1x128xf32, #tpu.memory_space<vmem>>, %arg7: memref<16x128xbf16, #tpu.memory_space<vmem>>) attributes {dimension_semantics = [#tpu.dimension_semantics<parallel>, #tpu.dimension_semantics<parallel>], iteration_bounds = array<i64: 1, 1>, scalar_prefetch = 0 : i64, scratch_operands = 0 : i64, tpu.core_type = #tpu.core_type<tc>, window_params = [{transform_indices = @transform_0, window_bounds = array<i64: 16, 32>}, {pipeline_mode = #tpu.pipeline_mode<synchronous>, transform_indices = @transform_1, window_bounds = array<i64: 1, 32>}, {pipeline_mode = #tpu.pipeline_mode<synchronous>, transform_indices = @transform_2, window_bounds = array<i64: 1, 32>}, {transform_indices = @transform_3, window_bounds = array<i64: 32, 128>}, {transform_indices = @transform_4, window_bounds = array<i64: 1, 128>}, {transform_indices = @transform_5, window_bounds = array<i64: 16, 128>}]} {
    %c0 = arith.constant 0 : index
    %c0_0 = arith.constant 0 : index
    %0 = vector.load %arg2[%c0, %c0_0] : memref<16x32xf32, #tpu.memory_space<vmem>>, vector<16x32xf32>
    %cst = arith.constant dense<0.000000e+00> : vector<16xf32>
    %1 = vector.multi_reduction <add>, %0, %cst [1] : vector<16x32xf32> to vector<16xf32>
    %2 = vector.shape_cast %1 : vector<16xf32> to vector<16x1xf32>
    %cst_1 = arith.constant 3.200000e+01 : f32
    %3 = vector.broadcast %cst_1 : f32 to vector<16x1xf32>
    %4 = arith.divf %2, %3 : vector<16x1xf32>
    %5 = vector.broadcast %4 : vector<16x1xf32> to vector<16x32xf32>
    %6 = arith.subf %0, %5 : vector<16x32xf32>
    %7 = arith.mulf %6, %6 : vector<16x32xf32>
    %cst_2 = arith.constant dense<0.000000e+00> : vector<16xf32>
    %8 = vector.multi_reduction <add>, %7, %cst_2 [1] : vector<16x32xf32> to vector<16xf32>
    %9 = vector.shape_cast %8 : vector<16xf32> to vector<16x1xf32>
    %cst_3 = arith.constant 3.200000e+01 : f32
    %10 = vector.broadcast %cst_3 : f32 to vector<16x1xf32>
    %11 = arith.divf %9, %10 : vector<16x1xf32>
    %cst_4 = arith.constant 9.99999974E-6 : f32
    %12 = vector.broadcast %cst_4 : f32 to vector<16x1xf32>
    %13 = arith.addf %11, %12 : vector<16x1xf32>
    %14 = math.rsqrt %13 : vector<16x1xf32>
    %15 = vector.broadcast %14 : vector<16x1xf32> to vector<16x32xf32>
    %16 = arith.mulf %6, %15 : vector<16x32xf32>
    %c0_5 = arith.constant 0 : index
    %c0_6 = arith.constant 0 : index
    %17 = vector.load %arg3[%c0_5, %c0_6] : memref<1x32xf32, #tpu.memory_space<vmem>>, vector<1x32xf32>
    %18 = vector.broadcast %17 : vector<1x32xf32> to vector<16x32xf32>
    %19 = arith.mulf %16, %18 : vector<16x32xf32>
    %c0_7 = arith.constant 0 : index
    %c0_8 = arith.constant 0 : index
    %20 = vector.load %arg4[%c0_7, %c0_8] : memref<1x32xf32, #tpu.memory_space<vmem>>, vector<1x32xf32>
    %21 = vector.broadcast %20 : vector<1x32xf32> to vector<16x32xf32>
    %22 = arith.addf %19, %21 : vector<16x32xf32>
    %23 = arith.truncf %22 : vector<16x32xf32> to vector<16x32xbf16>
    %c0_9 = arith.constant 0 : index
    %c0_10 = arith.constant 0 : index
    %24 = vector.load %arg5[%c0_9, %c0_10] : memref<32x128xbf16, #tpu.memory_space<vmem>>, vector<32x128xbf16>
    %cst_11 = arith.constant dense<0.000000e+00> : vector<16x128xf32>
    %25 = tpu.matmul %23, %24, %cst_11 {dimension_numbers = #tpu.dot_dimension_numbers<[1], [0], [0], [1], [0, 0, 1, 1], [], []>} : vector<16x32xbf16>, vector<32x128xbf16>, vector<16x128xf32> -> vector<16x128xf32>
    %c0_12 = arith.constant 0 : index
    %c0_13 = arith.constant 0 : index
    %26 = vector.load %arg6[%c0_12, %c0_13] : memref<1x128xf32, #tpu.memory_space<vmem>>, vector<1x128xf32>
    %27 = vector.broadcast %26 : vector<1x128xf32> to vector<16x128xf32>
    %28 = arith.addf %25, %27 : vector<16x128xf32>
    %cst_14 = arith.constant 5.000000e-01 : f32
    %29 = vector.broadcast %cst_14 : f32 to vector<16x128xf32>
    %30 = arith.mulf %29, %28 : vector<16x128xf32>
    %cst_15 = arith.constant 0.707106769 : f32
    %31 = vector.broadcast %cst_15 : f32 to vector<16x128xf32>
    %32 = arith.mulf %28, %31 : vector<16x128xf32>
    %33 = math.erf %32 : vector<16x128xf32>
    %cst_16 = arith.constant 1.000000e+00 : f32
    %34 = vector.broadcast %cst_16 : f32 to vector<16x128xf32>
    %35 = arith.addf %34, %33 : vector<16x128xf32>
    %36 = arith.mulf %30, %35 : vector<16x128xf32>
    %37 = arith.truncf %36 : vector<16x128xf32> to vector<16x128xbf16>
    %c0_17 = arith.constant 0 : index
    %c0_18 = arith.constant 0 : index
    %38 = vector.load %arg7[%c0_17, %c0_18] : memref<16x128xbf16, #tpu.memory_space<vmem>>, vector<16x128xbf16>
    tpu.vector_store %arg7[%c0_17, %c0_18], %37 {strides = array<i32>} : memref<16x128xbf16, #tpu.memory_space<vmem>>, vector<16x128xbf16>,
    return
  }
  func.func @transform_0(%arg0: i32, %arg1: i32) -> (i32, i32) {
    %c0_i32 = arith.constant 0 : i32
    %c0_i32_0 = arith.constant 0 : i32
    return %arg0, %c0_i32 : i32, i32
  }
  func.func @transform_1(%arg0: i32, %arg1: i32) -> (i32, i32) {
    %c0_i32 = arith.constant 0 : i32
    %c0_i32_0 = arith.constant 0 : i32
    %c0_i32_1 = arith.constant 0 : i32
    return %c0_i32, %c0_i32_0 : i32, i32
  }
  func.func @transform_2(%arg0: i32, %arg1: i32) -> (i32, i32) {
    %c0_i32 = arith.constant 0 : i32
    %c0_i32_0 = arith.constant 0 : i32
    %c0_i32_1 = arith.constant 0 : i32
    return %c0_i32, %c0_i32_0 : i32, i32
  }
  func.func @transform_3(%arg0: i32, %arg1: i32) -> (i32, i32) {
    %c0_i32 = arith.constant 0 : i32
    %c0_i32_0 = arith.constant 0 : i32
    return %c0_i32, %arg1 : i32, i32
  }
  func.func @transform_4(%arg0: i32, %arg1: i32) -> (i32, i32) {
    %c0_i32 = arith.constant 0 : i32
    %c0_i32_0 = arith.constant 0 : i32
    return %c0_i32, %arg1 : i32, i32
  }
  func.func @transform_5(%arg0: i32, %arg1: i32) -> (i32, i32) {
    %c0_i32 = arith.constant 0 : i32
    return %arg0, %arg1 : i32, i32
  }
}

module attributes {stable_mosaic.version = 11 : i64} {
  func.func @_matmul_bias_resid_kernel(%arg0: i32, %arg1: i32, %arg2: memref<16x128xbf16, #tpu.memory_space<vmem>>, %arg3: memref<128x32xbf16, #tpu.memory_space<vmem>>, %arg4: memref<1x32xf32, #tpu.memory_space<vmem>>, %arg5: memref<16x32xf32, #tpu.memory_space<vmem>>, %arg6: memref<16x32xf32, #tpu.memory_space<vmem>>) attributes {dimension_semantics = [#tpu.dimension_semantics<parallel>, #tpu.dimension_semantics<arbitrary>], iteration_bounds = array<i64: 1, 1>, scalar_prefetch = 0 : i64, scratch_operands = 0 : i64, tpu.core_type = #tpu.core_type<tc>, window_params = [{transform_indices = @transform_0, window_bounds = array<i64: 16, 128>}, {transform_indices = @transform_1, window_bounds = array<i64: 128, 32>}, {pipeline_mode = #tpu.pipeline_mode<synchronous>, transform_indices = @transform_2, window_bounds = array<i64: 1, 32>}, {transform_indices = @transform_3, window_bounds = array<i64: 16, 32>}, {transform_indices = @transform_4, window_bounds = array<i64: 16, 32>}]} {
    %c0_i32 = arith.constant 0 : i32
    %0 = arith.cmpi eq, %arg1, %c0_i32 : i32
    %1 = arith.extui %0 : i1 to i32
    %c0_i32_0 = arith.constant 0 : i32
    %2 = arith.cmpi ne, %1, %c0_i32_0 : i32
    scf.if %2 {
      %cst_10 = arith.constant 0.000000e+00 : f32
      %12 = vector.broadcast %cst_10 : f32 to vector<16x32xf32>
      %c0_11 = arith.constant 0 : index
      %c0_12 = arith.constant 0 : index
      %13 = vector.load %arg6[%c0_11, %c0_12] : memref<16x32xf32, #tpu.memory_space<vmem>>, vector<16x32xf32>
      tpu.vector_store %arg6[%c0_11, %c0_12], %12 {strides = array<i32>} : memref<16x32xf32, #tpu.memory_space<vmem>>, vector<16x32xf32>,
    } else {
    }
    %c0 = arith.constant 0 : index
    %c0_1 = arith.constant 0 : index
    %3 = vector.load %arg6[%c0, %c0_1] : memref<16x32xf32, #tpu.memory_space<vmem>>, vector<16x32xf32>
    %c0_2 = arith.constant 0 : index
    %c0_3 = arith.constant 0 : index
    %4 = vector.load %arg2[%c0_2, %c0_3] : memref<16x128xbf16, #tpu.memory_space<vmem>>, vector<16x128xbf16>
    %c0_4 = arith.constant 0 : index
    %c0_5 = arith.constant 0 : index
    %5 = vector.load %arg3[%c0_4, %c0_5] : memref<128x32xbf16, #tpu.memory_space<vmem>>, vector<128x32xbf16>
    %cst = arith.constant dense<0.000000e+00> : vector<16x32xf32>
    %6 = tpu.matmul %4, %5, %cst {dimension_numbers = #tpu.dot_dimension_numbers<[1], [0], [0], [1], [0, 0, 1, 1], [], []>} : vector<16x128xbf16>, vector<128x32xbf16>, vector<16x32xf32> -> vector<16x32xf32>
    %7 = arith.addf %3, %6 : vector<16x32xf32>
    %c0_6 = arith.constant 0 : index
    %c0_7 = arith.constant 0 : index
    %8 = vector.load %arg6[%c0_6, %c0_7] : memref<16x32xf32, #tpu.memory_space<vmem>>, vector<16x32xf32>
    tpu.vector_store %arg6[%c0_6, %c0_7], %7 {strides = array<i32>} : memref<16x32xf32, #tpu.memory_space<vmem>>, vector<16x32xf32>,
    %c0_i32_8 = arith.constant 0 : i32
    %9 = arith.cmpi eq, %arg1, %c0_i32_8 : i32
    %10 = arith.extui %9 : i1 to i32
    %c0_i32_9 = arith.constant 0 : i32
    %11 = arith.cmpi ne, %10, %c0_i32_9 : i32
    scf.if %11 {
      %c0_10 = arith.constant 0 : index
      %c0_11 = arith.constant 0 : index
      %12 = vector.load %arg6[%c0_10, %c0_11] : memref<16x32xf32, #tpu.memory_space<vmem>>, vector<16x32xf32>
      %c0_12 = arith.constant 0 : index
      %c0_13 = arith.constant 0 : index
      %13 = vector.load %arg4[%c0_12, %c0_13] : memref<1x32xf32, #tpu.memory_space<vmem>>, vector<1x32xf32>
      %c0_14 = arith.constant 0 : index
      %c0_15 = arith.constant 0 : index
      %14 = vector.load %arg5[%c0_14, %c0_15] : memref<16x32xf32, #tpu.memory_space<vmem>>, vector<16x32xf32>
      %15 = vector.broadcast %13 : vector<1x32xf32> to vector<16x32xf32>
      %16 = arith.addf %15, %14 : vector<16x32xf32>
      %17 = arith.addf %12, %16 : vector<16x32xf32>
      %c0_16 = arith.constant 0 : index
      %c0_17 = arith.constant 0 : index
      %18 = vector.load %arg6[%c0_16, %c0_17] : memref<16x32xf32, #tpu.memory_space<vmem>>, vector<16x32xf32>
      tpu.vector_store %arg6[%c0_16, %c0_17], %17 {strides = array<i32>} : memref<16x32xf32, #tpu.memory_space<vmem>>, vector<16x32xf32>,
    } else {
    }
    return
  }
  func.func @transform_0(%arg0: i32, %arg1: i32) -> (i32, i32) {
    %c0_i32 = arith.constant 0 : i32
    return %arg0, %arg1 : i32, i32
  }
  func.func @transform_1(%arg0: i32, %arg1: i32) -> (i32, i32) {
    %c0_i32 = arith.constant 0 : i32
    %c0_i32_0 = arith.constant 0 : i32
    return %arg1, %c0_i32 : i32, i32
  }
  func.func @transform_2(%arg0: i32, %arg1: i32) -> (i32, i32) {
    %c0_i32 = arith.constant 0 : i32
    %c0_i32_0 = arith.constant 0 : i32
    %c0_i32_1 = arith.constant 0 : i32
    return %c0_i32, %c0_i32_0 : i32, i32
  }
  func.func @transform_3(%arg0: i32, %arg1: i32) -> (i32, i32) {
    %c0_i32 = arith.constant 0 : i32
    %c0_i32_0 = arith.constant 0 : i32
    return %arg0, %c0_i32 : i32, i32
  }
  func.func @transform_4(%arg0: i32, %arg1: i32) -> (i32, i32) {
    %c0_i32 = arith.constant 0 : i32
    %c0_i32_0 = arith.constant 0 : i32
    return %arg0, %c0_i32 : i32, i32
  }
}

</mosaic_0001>

<bundles_post_ra>
// kernel: block_forward.7
= control target key start
LH: loop header
LB: loop body
LE: loop exit
PB: predicated region body
PF: predicated region fallthrough
CT: control target
= control target key end

     0   :  { %9 = vsyncpa [#allocation3], 0  ;;  %s463_s0 = inlined_call_operand.hbm [shape: bf16[16,32], index: 0, kind: input, shape index: {}]   ;;  %s464_s1 = inlined_call_operand.hbm [shape: bf16[32,32], index: 1, kind: input, shape index: {}]   ;;  %s465_s2 = inlined_call_operand.hbm [shape: f32[1,32], index: 2, kind: input, shape index: {}]   ;;  %s466_s3 = inlined_call_operand.hbm [shape: f32[16,32], index: 3, kind: input, shape index: {}]   ;;  %s467_s4 = inlined_call_operand.hbm [shape: f32[16,32], index: 4, kind: output, shape index: {}]  }
   0x1   :  { %10 = vsyncpa [#allocation6], 0 }
   0x2   :  { %11 = vsyncpa [#allocation9], 0 }
   0x3   :  { %12 = vsyncpa [#allocation4], 0  ;;  %s340_s15 = smov [#allocation5]   ;;  %s341_s17 = smov [#allocation2]  }
   0x4   :  { %s30_s16 = sshll.u32 %s340_s15, 4  ;;  %s18_s18 = sshll.u32 %s341_s17, 4  ;;  %s31_s16 = int_to_ptr.vmem [resolvable:$true] %s30_s16  ;;  %s376_s18 = int_to_ptr.vmem [resolvable:$true] %s18_s18 }
   0x5   :  { %s222_s21 = scalar_lea.hbm %s464_s1, 256 }
   0x6   :  { %p223_p0 = scmp.ne.s32.totalorder %s464_s1, %s222_s21  ;;  %p226_p1 = scmp.lt.u32.totalorder %s222_s21, %s464_s1 }
   0x8   :  { %p228_p2 = pnand %p226_p1, %p223_p0 }
   0xa   :  { %231 = shalt.err (!%p228_p2)
}
   0xb   :  { %s232_s26 = scalar_lea.vmem %s31_s16, 256  ;;  %p237_p4 = scmp.lt.s32.totalorder %s31_s16, %s31_s16 }
   0xc   :  { %p233_p3 = scmp.ne.s32.totalorder %s31_s16, %s232_s26  ;;  %p238_p5 = scmp.lt.s32.totalorder %s232_s26, %s232_s26 }
   0xe   :  { %p239_p6 = por %p238_p5, %p237_p4 }
  0x10   :  { %p240_p7 = pnand %p239_p6, %p233_p3 }
  0x12   :  { %243 = shalt.err (!%p240_p7)
}
  0x13   :  { %s342_s27 = smov 64   ;;  %s343_s28 = smov 4  }
  0x14   :  { %36 = dma.hbm_to_vmem [thread:$0]  %s464_s1, 256, %s31_s16, [#allocation6], %s342_s27, %s342_s27, %s343_s28  }
  0x15   :  { %s244_s7 = scalar_lea.hbm %s463_s0, 128 }
  0x16   :  { %p245_p8 = scmp.ne.s32.totalorder %s463_s0, %s244_s7  ;;  %p248_p9 = scmp.lt.u32.totalorder %s244_s7, %s463_s0 }
  0x18   :  { %p250_p10 = pnand %p248_p9, %p245_p8 }
  0x1a   :  { %253 = shalt.err (!%p250_p10)
}
  0x1b   :  { %s254_s12 = scalar_lea.vmem %s376_s18, 128  ;;  %p259_p12 = scmp.lt.s32.totalorder %s376_s18, %s376_s18 }
  0x1c   :  { %p255_p11 = scmp.ne.s32.totalorder %s376_s18, %s254_s12  ;;  %p260_p13 = scmp.lt.s32.totalorder %s254_s12, %s254_s12 }
  0x1e   :  { %p261_p0 = por %p260_p13, %p259_p12 }
  0x20   :  { %p262_p1 = pnand %p261_p0, %p255_p11 }
  0x22   :  { %265 = shalt.err (!%p262_p1)
}
  0x23   :  { %24 = dma.hbm_to_vmem [thread:$0]  %s463_s0, 128, %s376_s18, [#allocation3], %s342_s27, %s342_s27, %s343_s28  }
  0x24   :  { %s344_s14 = smov [#allocation7]   ;;  %s345_s16 = smov [#allocation8]  }
  0x25   :  { %s43_s15 = sshll.u32 %s344_s14, 4  ;;  %s52_s17 = sshll.u32 %s345_s16, 4  ;;  %s44_s15 = int_to_ptr.vmem [resolvable:$true] %s43_s15  ;;  %s407_s17 = int_to_ptr.vmem [resolvable:$true] %s52_s17 }
  0x26   :  { %s266_s21 = scalar_lea.hbm %s465_s2, 16 }
  0x27   :  { %p267_p2 = scmp.ne.s32.totalorder %s465_s2, %s266_s21  ;;  %p270_p3 = scmp.lt.u32.totalorder %s266_s21, %s465_s2 }
  0x29   :  { %p272_p4 = pnand %p270_p3, %p267_p2 }
  0x2b   :  { %275 = shalt.err (!%p272_p4)
}
  0x2c   :  { %s276_s0 = scalar_lea.vmem %s44_s15, 16  ;;  %s280_s18 = scalar_lea.vmem %s44_s15, 32 }
  0x2d   :  { %p277_p5 = scmp.ne.s32.totalorder %s44_s15, %s276_s0  ;;  %p281_p6 = scmp.lt.s32.totalorder %s44_s15, %s44_s15 }
  0x2e   :  { %p282_p7 = scmp.lt.s32.totalorder %s280_s18, %s276_s0 }
  0x30   :  { %p283_p8 = por %p282_p7, %p281_p6 }
  0x32   :  { %p284_p9 = pnand %p283_p8, %p277_p5 }
  0x34   :  { %287 = shalt.err (!%p284_p9)
}
  0x35   :  { %46 = dma.hbm_to_vmem [thread:$0]  %s465_s2, 16, %s44_s15, [#allocation6]  }
  0x36   :  { %s288_s30 = scalar_lea.hbm %s466_s3, 256 }
  0x37   :  { %p289_p10 = scmp.ne.s32.totalorder %s466_s3, %s288_s30  ;;  %p292_p11 = scmp.lt.u32.totalorder %s288_s30, %s466_s3 }
  0x39   :  { %p294_p12 = pnand %p292_p11, %p289_p10 }
  0x3b   :  { %297 = shalt.err (!%p294_p12)
}
  0x3c   :  { %s298_s9 = scalar_lea.vmem %s407_s17, 256  ;;  %p303_p0 = scmp.lt.s32.totalorder %s407_s17, %s407_s17 }
  0x3d   :  { %p299_p13 = scmp.ne.s32.totalorder %s407_s17, %s298_s9  ;;  %p304_p1 = scmp.lt.s32.totalorder %s298_s9, %s298_s9 }
  0x3f   :  { %p305_p2 = por %p304_p1, %p303_p0 }
  0x41   :  { %p306_p3 = pnand %p305_p2, %p299_p13 }
  0x43   :  { %309 = shalt.err (!%p306_p3)
}
  0x44   :  { %s346_s2 = smov 128   ;;  %s347_s10 = smov 8  }
  0x45   :  { %58 = dma.hbm_to_vmem [thread:$0]  %s466_s3, 256, %s407_s17, [#allocation9], %s346_s2, %s346_s2, %s347_s10  }
  0x46   :  { %332 = dma.done.wait [#allocation3], 128  }
  0x47   :  { %333 = vsyncadd [#allocation3], 4294967168 }
  0x48   :  { %334 = dma.done.wait [#allocation6], 272  }
  0x49   :  { %335 = vsyncadd [#allocation6], 4294967024 }
  0x4a   :  { %336 = dma.done.wait [#allocation9], 256  }
  0x4b   :  { %337 = vsyncadd [#allocation9], 4294967040  ;;  %vm76_vm0 = vcmask 261120   ;;  %v348_v0 = vmov 0.0   ;;  %vm349_vm1 = vmmov 0   ;;  %v219_v1 = vld [vmem:[#allocation5] sm:$0xff]  }
  0x4c   :  { %200 = vmatprep.subr.bf16.mxu0 %v348_v0  ;;  %204 = vmatprep.mubr.msk.bf16.mxu0 %vm349_vm1, %v348_v0  ;;  %77 = vst.msk [vmem:[#allocation10] sm:$0xff] %vm76_vm0, %v348_v0  ;;  %78 = vst.msk [vmem:[#allocation10 + $0x8] sm:$0xff] %vm76_vm0, %v348_v0  ;;  %v220_v2 = vld [vmem:[#allocation5 + $0x8] sm:$0xff]   ;;  %v221_v3 = vld [vmem:[#allocation2] sm:$0xff]   ;;  %s350_s3 = smov [#allocation10]  }
  0x4d   :  { %201 = vmatpush3.bf16.msra.mxu0 %v219_v1  ;;  %v196_v12 = vld [vmem:[#allocation7] ss:$0 sm:$0xff]  ;;  %v159_v13 = vld [vmem:[#allocation8] sm:$0xff]  ;;  %v160_v14 = vld [vmem:[#allocation8 + $0x8] sm:$0xff]  ;;  %s178_s1 = sshll.u32 %s350_s3, 4  ;;  %s179_s1 = int_to_ptr.vmem [resolvable:$true] %s178_s1 }
  0x4e   :  { %202 = vmatprep.subr.bf16.mxu0 %v348_v0  ;;  %v167_v15 = vadd.f32 %v196_v12, %v159_v13  ;;  %v168_v16 = vadd.f32 %v196_v12, %v160_v14  ;;  %s310_s13 = scalar_lea.vmem %s179_s1, 256  ;;  %p315_p5 = scmp.lt.s32.totalorder %s179_s1, %s179_s1 }
  0x4f   :  { %p311_p4 = scmp.ne.s32.totalorder %s179_s1, %s310_s13  ;;  %p316_p6 = scmp.lt.s32.totalorder %s310_s13, %s310_s13 }
  0x51   :  { %203 = vmatpush3.bf16.msra.mxu0 %v220_v2  ;;  %p317_p7 = por %p316_p6, %p315_p5 }
  0x53   :  { %v79_v4 = vld [vmem:[#allocation10] sm:$0xff]  ;;  %v80_v6 = vld [vmem:[#allocation10 + $0x8] sm:$0xff]  ;;  %p318_p8 = pnand %p317_p7, %p311_p4 }
  0x54   :  { %205 = vmatmul.mubr.msk.bf16.vlgmr.msra.gmra.mrb[0].mxu0 %vm76_vm0, %v221_v3 }
 0x127   :  { %v142_v5 = vpop.f32.mrb[0].mxu0 }
 0x128   :  { %v149_v7 = vadd.f32 %v142_v5, %v79_v4  ;;  %v206_v8 = vpop.f32.mrb[1].mxu0 }
 0x129   :  { %v145_v9 = vpop.f32.mrb[2].mxu0 }
 0x12a   :  { %151 = vst.msk [vmem:[#allocation10] sm:$0xff] %vm76_vm0, %v149_v7  ;;  %v150_v10 = vadd.f32 %v145_v9, %v80_v6  ;;  %v207_v11 = vpop.f32.mrb[3].mxu0 }
 0x12c   :  { %152 = vst.msk [vmem:[#allocation10 + $0x8] sm:$0xff] %vm76_vm0, %v150_v10 }
 0x131   :  { %v156_v17 = vld [vmem:[#allocation10] sm:$0xff] }
 0x132   :  { %v169_v18 = vadd.f32 %v167_v15, %v156_v17 }
 0x133   :  { %v157_v19 = vld [vmem:[#allocation10 + $0x8] sm:$0xff] }
 0x134   :  { %v170_v20 = vadd.f32 %v168_v16, %v157_v19  ;;  %171 = vst.msk [vmem:[#allocation10] sm:$0xff] %vm76_vm0, %v169_v18 }
 0x136   :  { %172 = vst.msk [vmem:[#allocation10 + $0x8] sm:$0xff] %vm76_vm0, %v170_v20 }
 0x137   :  { %321 = shalt.err (!%p318_p8)
}
 0x138   :  { %s322_s16 = scalar_lea.hbm %s467_s4, 256 }
 0x139   :  { %p323_p9 = scmp.ne.s32.totalorder %s467_s4, %s322_s16  ;;  %p326_p10 = scmp.lt.u32.totalorder %s322_s16, %s467_s4 }
 0x13b   :  { %p328_p11 = pnand %p326_p10, %p323_p9 }
 0x13d   :  { %331 = shalt.err (!%p328_p11)
}
 0x13e   :  { %184 = dma.vmem_to_hbm [thread:$0]  %s179_s1, 256, %s467_s4, [#allocation4], %s346_s2, %s346_s2, %s347_s10  }
 0x13f   :  { %338 = dma.done.wait [#allocation4], 256  }
 0x140   :  { %339 = vsyncadd [#allocation4], 4294967040 }
 0x141   :  { %188 = vsyncpa [#allocation3], 1 }
 0x142   :  { %189 = vsyncpa [#allocation6], 1 }
 0x143   :  { %190 = vsyncpa [#allocation9], 1 }
 0x144   :  { %191 = vsyncpa [#allocation4], 1 }

// kernel: block_forward.5
= control target key start
LH: loop header
LB: loop body
LE: loop exit
PB: predicated region body
PF: predicated region fallthrough
CT: control target
= control target key end

     0   :  { %11 = vsyncpa [#allocation3], 0  ;;  %s564_s0 = inlined_call_operand.hbm [shape: f32[16,32], index: 0, kind: input, shape index: {}]   ;;  %s565_s1 = inlined_call_operand.hbm [shape: f32[1,32], index: 1, kind: input, shape index: {}]   ;;  %s566_s2 = inlined_call_operand.hbm [shape: f32[1,32], index: 2, kind: input, shape index: {}]   ;;  %s567_s3 = inlined_call_operand.hbm [shape: bf16[32,64], index: 3, kind: input, shape index: {}]   ;;  %s568_s4 = inlined_call_operand.hbm [shape: bf16[16,64], index: 4, kind: output, shape index: {0}]   ;;  %s569_s5 = inlined_call_operand.hbm [shape: bf16[16,32], index: 5, kind: output, shape index: {1}]  }
   0x1   :  { %12 = vsyncpa [#allocation6], 0 }
   0x2   :  { %13 = vsyncpa [#allocation9], 0 }
   0x3   :  { %14 = vsyncpa [#allocation4], 0 }
   0x4   :  { %15 = vsyncpa [#allocation12], 0  ;;  %s422_s18 = smov [#allocation5]   ;;  %s423_s20 = smov [#allocation2]  }
   0x5   :  { %s34_s19 = sshll.u32 %s422_s18, 4  ;;  %s21_s21 = sshll.u32 %s423_s20, 4  ;;  %s35_s19 = int_to_ptr.vmem [resolvable:$true] %s34_s19  ;;  %s464_s21 = int_to_ptr.vmem [resolvable:$true] %s21_s21 }
   0x6   :  { %s280_s24 = scalar_lea.hbm %s565_s1, 16 }
   0x7   :  { %p281_p0 = scmp.ne.s32.totalorder %s565_s1, %s280_s24  ;;  %p284_p1 = scmp.lt.u32.totalorder %s280_s24, %s565_s1 }
   0x9   :  { %p286_p2 = pnand %p284_p1, %p281_p0 }
   0xb   :  { %289 = shalt.err (!%p286_p2)
}
   0xc   :  { %s290_s29 = scalar_lea.vmem %s35_s19, 16  ;;  %s294_s30 = scalar_lea.vmem %s35_s19, 32 }
   0xd   :  { %p291_p3 = scmp.ne.s32.totalorder %s35_s19, %s290_s29  ;;  %p295_p4 = scmp.lt.s32.totalorder %s35_s19, %s35_s19 }
   0xe   :  { %p296_p5 = scmp.lt.s32.totalorder %s294_s30, %s290_s29 }
  0x10   :  { %p297_p6 = por %p296_p5, %p295_p4 }
  0x12   :  { %p298_p7 = pnand %p297_p6, %p291_p3 }
  0x14   :  { %301 = shalt.err (!%p298_p7)
}
  0x15   :  { %37 = dma.hbm_to_vmem [thread:$0]  %s565_s1, 16, %s35_s19, [#allocation6]  }
  0x16   :  { %s302_s10 = scalar_lea.hbm %s564_s0, 256 }
  0x17   :  { %p303_p8 = scmp.ne.s32.totalorder %s564_s0, %s302_s10  ;;  %p306_p9 = scmp.lt.u32.totalorder %s302_s10, %s564_s0 }
  0x19   :  { %p308_p10 = pnand %p306_p9, %p303_p8 }
  0x1b   :  { %311 = shalt.err (!%p308_p10)
}
  0x1c   :  { %s312_s15 = scalar_lea.vmem %s464_s21, 256  ;;  %p317_p12 = scmp.lt.s32.totalorder %s464_s21, %s464_s21 }
  0x1d   :  { %p313_p11 = scmp.ne.s32.totalorder %s464_s21, %s312_s15  ;;  %p318_p13 = scmp.lt.s32.totalorder %s312_s15, %s312_s15 }
  0x1f   :  { %p319_p0 = por %p318_p13, %p317_p12 }
  0x21   :  { %p320_p1 = pnand %p319_p0, %p313_p11 }
  0x23   :  { %323 = shalt.err (!%p320_p1)
}
  0x24   :  { %s424_s1 = smov 128   ;;  %s425_s16 = smov 8  }
  0x25   :  { %27 = dma.hbm_to_vmem [thread:$0]  %s564_s0, 256, %s464_s21, [#allocation3], %s424_s1, %s424_s1, %s425_s16  }
  0x26   :  { %s426_s19 = smov [#allocation7]   ;;  %s427_s22 = smov [#allocation8]  }
  0x27   :  { %s44_s20 = sshll.u32 %s426_s19, 4  ;;  %s53_s23 = sshll.u32 %s427_s22, 4  ;;  %s45_s20 = int_to_ptr.vmem [resolvable:$true] %s44_s20  ;;  %s495_s23 = int_to_ptr.vmem [resolvable:$true] %s53_s23 }
  0x28   :  { %s324_s26 = scalar_lea.hbm %s566_s2, 16 }
  0x29   :  { %p325_p2 = scmp.ne.s32.totalorder %s566_s2, %s324_s26  ;;  %p328_p3 = scmp.lt.u32.totalorder %s324_s26, %s566_s2 }
  0x2b   :  { %p330_p4 = pnand %p328_p3, %p325_p2 }
  0x2d   :  { %333 = shalt.err (!%p330_p4)
}
  0x2e   :  { %s334_s0 = scalar_lea.vmem %s45_s20, 16  ;;  %s338_s21 = scalar_lea.vmem %s45_s20, 32 }
  0x2f   :  { %p335_p5 = scmp.ne.s32.totalorder %s45_s20, %s334_s0  ;;  %p339_p6 = scmp.lt.s32.totalorder %s45_s20, %s45_s20 }
  0x30   :  { %p340_p7 = scmp.lt.s32.totalorder %s338_s21, %s334_s0 }
  0x32   :  { %p341_p8 = por %p340_p7, %p339_p6 }
  0x34   :  { %p342_p9 = pnand %p341_p8, %p335_p5 }
  0x36   :  { %345 = shalt.err (!%p342_p9)
}
  0x37   :  { %47 = dma.hbm_to_vmem [thread:$0]  %s566_s2, 16, %s45_s20, [#allocation6]  }
  0x38   :  { %s346_s10 = scalar_lea.hbm %s567_s3, 256 }
  0x39   :  { %p347_p10 = scmp.ne.s32.totalorder %s567_s3, %s346_s10  ;;  %p350_p11 = scmp.lt.u32.totalorder %s346_s10, %s567_s3 }
  0x3b   :  { %p352_p12 = pnand %p350_p11, %p347_p10 }
  0x3d   :  { %355 = shalt.err (!%p352_p12)
}
  0x3e   :  { %s356_s15 = scalar_lea.vmem %s495_s23, 256  ;;  %p361_p0 = scmp.lt.s32.totalorder %s495_s23, %s495_s23 }
  0x3f   :  { %p357_p13 = scmp.ne.s32.totalorder %s495_s23, %s356_s15  ;;  %p362_p1 = scmp.lt.s32.totalorder %s356_s15, %s356_s15 }
  0x41   :  { %p363_p2 = por %p362_p1, %p361_p0 }
  0x43   :  { %p364_p3 = pnand %p363_p2, %p357_p13 }
  0x45   :  { %367 = shalt.err (!%p364_p3)
}
  0x46   :  { %s428_s2 = smov 64   ;;  %s429_s1 = smov 4  }
  0x47   :  { %59 = dma.hbm_to_vmem [thread:$0]  %s567_s3, 256, %s495_s23, [#allocation9], %s428_s2, %s428_s2, %s429_s1  }
  0x48   :  { %412 = dma.done.wait [#allocation3], 256  }
  0x49   :  { %413 = vsyncadd [#allocation3], 4294967040 }
  0x4a   :  { %414 = dma.done.wait [#allocation6], 32  }
  0x4b   :  { %415 = vsyncadd [#allocation6], 4294967264 }
  0x4c   :  { %416 = dma.done.wait [#allocation9], 256  }
  0x4d   :  { %417 = vsyncadd [#allocation9], 4294967040  ;;  %vm75_vm0 = vcmask 261120   ;;  %v73_v0 = vld [vmem:[#allocation2] sm:$0xff]  ;;  %v74_v1 = vld [vmem:[#allocation2 + $0x8] sm:$0xff]  ;;  %v430_v15 = vmov 0.0  }
  0x4e   :  { %v76_v2 = vsel %vm75_vm0, %v73_v0, 0.0  ;;  %v79_v3 = vsel %vm75_vm0, %v74_v1, 0.0  ;;  %v274_v14 = vld [vmem:[#allocation8] sm:$0xff]   ;;  %254 = vmatprep.subr.bf16.mxu0 %v430_v15  ;;  %v275_v16 = vld [vmem:[#allocation8 + $0x8] sm:$0xff]   ;;  %vm431_vm1 = vmmov 0   ;;  %vm129_vm2 = vcmask 257024  }
  0x4f   :  { %77 = vadd.xlane.f32.xlu0 %v76_v2  ;;  %255 = vmatpush3.bf16.msra.mxu0 %v274_v14  ;;  %v238_v24 = vld [vmem:[#allocation5] ss:$0 sm:$0xff]  ;;  %v239_v26 = vld [vmem:[#allocation7] ss:$0 sm:$0xff]  ;;  %s432_s3 = smov [#allocation11]  }
  0x50   :  { %258 = vmatprep.mubr.msk.bf16.mxu0 %vm431_vm1, %v430_v15  ;;  %256 = vmatprep.subr.bf16.mxu0 %v430_v15  ;;  %s220_s18 = sshll.u32 %s432_s3, 4  ;;  %s221_s18 = int_to_ptr.vmem [resolvable:$true] %s220_s18 }
  0x51   :  { %s368_s19 = scalar_lea.vmem %s221_s18, 128  ;;  %p373_p5 = scmp.lt.s32.totalorder %s221_s18, %s221_s18 }
  0x52   :  { %p369_p4 = scmp.ne.s32.totalorder %s221_s18, %s368_s19  ;;  %p374_p6 = scmp.lt.s32.totalorder %s368_s19, %s368_s19 }
  0x53   :  { %80 = vadd.xlane.f32.xlu0 %v79_v3  ;;  %257 = vmatpush3.bf16.msra.mxu0 %v275_v16 }
  0x54   :  { %p375_p7 = por %p374_p6, %p373_p5 }
  0x56   :  { %p376_p8 = pnand %p375_p7, %p369_p4 }
  0xdc   :  { %v78_v4 = vpop.xlane.xlu0 %77 }
  0xdd   :  { %v83_v5 = vmul.f32 0.03125, %v78_v4 }
  0xdf   :  { %v85_v6 = vsub.f32 %v73_v0, %v83_v5 }
  0xe0   :  { %v81_v7 = vpop.xlane.xlu0 %80 }
  0xe1   :  { %v84_v8 = vmul.f32 0.03125, %v81_v7  ;;  %v87_v9 = vmul.f32 %v85_v6, %v85_v6 }
  0xe3   :  { %v86_v10 = vsub.f32 %v74_v1, %v84_v8  ;;  %v89_v11 = vsel %vm75_vm0, %v87_v9, 0.0 }
  0xe4   :  { %90 = vadd.xlane.f32.xlu1 %v89_v11 }
  0xe5   :  { %v88_v12 = vmul.f32 %v86_v10, %v86_v10 }
  0xe7   :  { %v92_v13 = vsel %vm75_vm0, %v88_v12, 0.0 }
  0xe8   :  { %93 = vadd.xlane.f32.xlu1 %v92_v13 }
 0x171   :  { %v91_v17 = vpop.xlane.xlu1 %90 }
 0x172   :  { %v95_v18 = vmul.f32 0.03125, %v91_v17 }
 0x174   :  { %v97_v19 = vadd.f32 1e-05, %v95_v18 }
 0x175   :  { %v94_v20 = vpop.xlane.xlu1 %93 }
 0x176   :  { %276 = vrsqrt.f32 %v97_v19  ;;  %v96_v21 = vmul.f32 0.03125, %v94_v20 }
 0x178   :  { %v98_v22 = vadd.f32 1e-05, %v96_v21 }
 0x17a   :  { %278 = vrsqrt.f32 %v98_v22 }
 0x180   :  { %v277_v23 = vpop.eup %276 }
 0x181   :  { %v101_v25 = vmul.f32 %v277_v23, %v85_v6 }
 0x183   :  { %v110_v27 = vmul.f32 %v238_v24, %v101_v25 }
 0x184   :  { %v279_v28 = vpop.eup %278 }
 0x185   :  { %v102_v29 = vmul.f32 %v279_v28, %v86_v10  ;;  %v119_v30 = vadd.f32 %v239_v26, %v110_v27 }
 0x187   :  { %v111_v31 = vmul.f32 %v238_v24, %v102_v29  ;;  %v247_v32 = vpack.c.bf16 %v119_v30, %v119_v30 }
 0x189   :  { %v120_v33 = vadd.f32 %v239_v26, %v111_v31  ;;  %130 = vst.msk [vmem:[#allocation11] sm:$0xf] %vm129_vm2, %v247_v32 }
 0x18b   :  { %v121_v34 = vpack.c.bf16 %v120_v33, %v119_v30  ;;  %v248_v35 = vpack.c.bf16 %v120_v33, %v120_v33 }
 0x18d   :  { %259 = vmatmul.mubr.msk.bf16.vlgmr.msra.gmra.mrb[0].mxu0 %vm75_vm0, %v121_v34  ;;  %131 = vst.msk [vmem:[#allocation11 + $0x4] sm:$0xf] %vm129_vm2, %v248_v35 }
 0x18e   :  { %379 = shalt.err (!%p376_p8)
}
 0x18f   :  { %s380_s23 = scalar_lea.hbm %s569_s5, 128 }
 0x190   :  { %p381_p9 = scmp.ne.s32.totalorder %s569_s5, %s380_s23  ;;  %p384_p10 = scmp.lt.u32.totalorder %s380_s23, %s569_s5 }
 0x192   :  { %p386_p11 = pnand %p384_p10, %p381_p9 }
 0x194   :  { %389 = shalt.err (!%p386_p11)
}
 0x195   :  { %226 = dma.vmem_to_hbm [thread:$0]  %s221_s18, 128, %s569_s5, [#allocation12], %s428_s2, %s428_s2, %s429_s1   ;;  %vm200_vm3 = vcmask 519168  }
 0x196   :  { %s433_s30 = smov [#allocation10]  }
 0x197   :  { %s208_s0 = sshll.u32 %s433_s30, 4  ;;  %s209_s0 = int_to_ptr.vmem [resolvable:$true] %s208_s0 }
 0x198   :  { %s390_s21 = scalar_lea.vmem %s209_s0, 128  ;;  %p395_p13 = scmp.lt.s32.totalorder %s209_s0, %s209_s0 }
 0x199   :  { %p391_p12 = scmp.ne.s32.totalorder %s209_s0, %s390_s21  ;;  %p396_p0 = scmp.lt.s32.totalorder %s390_s21, %s390_s21 }
 0x19b   :  { %p397_p1 = por %p396_p0, %p395_p13 }
 0x19d   :  { %p398_p2 = pnand %p397_p1, %p391_p12 }
 0x260   :  { %v185_v36 = vpop.f32.mrb[0].mxu0 }
 0x261   :  { %v249_v37 = vpack.c.bf16 %v185_v36, %v185_v36  ;;  %v260_v38 = vpop.f32.mrb[1].mxu0 }
 0x262   :  { %v188_v39 = vpop.f32.mrb[2].mxu0 }
 0x263   :  { %v250_v40 = vpack.c.bf16 %v188_v39, %v188_v39  ;;  %v261_v41 = vpop.f32.mrb[3].mxu0  ;;  %201 = vst.msk [vmem:[#allocation10] sm:$0xf] %vm200_vm3, %v249_v37 }
 0x265   :  { %202 = vst.msk [vmem:[#allocation10 + $0x4] sm:$0xf] %vm200_vm3, %v250_v40 }
 0x266   :  { %401 = shalt.err (!%p398_p2)
}
 0x267   :  { %s402_s7 = scalar_lea.hbm %s568_s4, 128 }
 0x268   :  { %p403_p3 = scmp.ne.s32.totalorder %s568_s4, %s402_s7  ;;  %p406_p4 = scmp.lt.u32.totalorder %s402_s7, %s568_s4 }
 0x26a   :  { %p408_p5 = pnand %p406_p4, %p403_p3 }
 0x26c   :  { %411 = shalt.err (!%p408_p5)
}
 0x26d   :  { %214 = dma.vmem_to_hbm [thread:$0]  %s209_s0, 128, %s568_s4, [#allocation4], %s428_s2, %s428_s2, %s429_s1  }
 0x26e   :  { %418 = dma.done.wait [#allocation4], 128  }
 0x26f   :  { %419 = vsyncadd [#allocation4], 4294967168 }
 0x270   :  { %420 = dma.done.wait [#allocation12], 128  }
 0x271   :  { %421 = vsyncadd [#allocation12], 4294967168 }
 0x272   :  { %233 = vsyncpa [#allocation3], 1 }
 0x273   :  { %234 = vsyncpa [#allocation6], 1 }
 0x274   :  { %235 = vsyncpa [#allocation9], 1 }
 0x275   :  { %236 = vsyncpa [#allocation4], 1 }
 0x276   :  { %237 = vsyncpa [#allocation12], 1 }

// kernel: block_forward.8
= control target key start
LH: loop header
LB: loop body
LE: loop exit
PB: predicated region body
PF: predicated region fallthrough
CT: control target
= control target key end

     0   :  { %10 = vsyncpa [#allocation3], 0  ;;  %s559_s0 = inlined_call_operand.hbm [shape: f32[16,32], index: 0, kind: input, shape index: {}]   ;;  %s560_s1 = inlined_call_operand.hbm [shape: f32[1,32], index: 1, kind: input, shape index: {}]   ;;  %s561_s2 = inlined_call_operand.hbm [shape: f32[1,32], index: 2, kind: input, shape index: {}]   ;;  %s562_s3 = inlined_call_operand.hbm [shape: bf16[32,128], index: 3, kind: input, shape index: {}]   ;;  %s563_s4 = inlined_call_operand.hbm [shape: f32[1,128], index: 4, kind: input, shape index: {}]   ;;  %s564_s5 = inlined_call_operand.hbm [shape: bf16[16,128], index: 5, kind: output, shape index: {}]  }
   0x1   :  { %11 = vsyncpa [#allocation6], 0 }
   0x2   :  { %12 = vsyncpa [#allocation9], 0 }
   0x3   :  { %13 = vsyncpa [#allocation4], 0  ;;  %s427_s18 = smov [#allocation5]   ;;  %s428_s20 = smov [#allocation8]  }
   0x4   :  { %s32_s19 = sshll.u32 %s427_s18, 4  ;;  %s51_s21 = sshll.u32 %s428_s20, 4  ;;  %s33_s19 = int_to_ptr.vmem [resolvable:$true] %s32_s19  ;;  %s469_s21 = int_to_ptr.vmem [resolvable:$true] %s51_s21 }
   0x5   :  { %s287_s24 = scalar_lea.hbm %s560_s1, 16 }
   0x6   :  { %p288_p0 = scmp.ne.s32.totalorder %s560_s1, %s287_s24  ;;  %p291_p1 = scmp.lt.u32.totalorder %s287_s24, %s560_s1 }
   0x8   :  { %p293_p2 = pnand %p291_p1, %p288_p0 }
   0xa   :  { %296 = shalt.err (!%p293_p2)
}
   0xb   :  { %s297_s29 = scalar_lea.vmem %s33_s19, 16  ;;  %s301_s30 = scalar_lea.vmem %s33_s19, 32 }
   0xc   :  { %p298_p3 = scmp.ne.s32.totalorder %s33_s19, %s297_s29  ;;  %p302_p4 = scmp.lt.s32.totalorder %s33_s19, %s33_s19 }
   0xd   :  { %p303_p5 = scmp.lt.s32.totalorder %s301_s30, %s297_s29 }
   0xf   :  { %p304_p6 = por %p303_p5, %p302_p4 }
  0x11   :  { %p305_p7 = pnand %p304_p6, %p298_p3 }
  0x13   :  { %308 = shalt.err (!%p305_p7)
}
  0x14   :  { %35 = dma.hbm_to_vmem [thread:$0]  %s560_s1, 16, %s33_s19, [#allocation6]  }
  0x15   :  { %s309_s10 = scalar_lea.hbm %s562_s3, 256 }
  0x16   :  { %p310_p8 = scmp.ne.s32.totalorder %s562_s3, %s309_s10  ;;  %p313_p9 = scmp.lt.u32.totalorder %s309_s10, %s562_s3 }
  0x18   :  { %p315_p10 = pnand %p313_p9, %p310_p8 }
  0x1a   :  { %318 = shalt.err (!%p315_p10)
}
  0x1b   :  { %s319_s15 = scalar_lea.vmem %s469_s21, 256  ;;  %p324_p12 = scmp.lt.s32.totalorder %s469_s21, %s469_s21 }
  0x1c   :  { %p320_p11 = scmp.ne.s32.totalorder %s469_s21, %s319_s15  ;;  %p325_p13 = scmp.lt.s32.totalorder %s319_s15, %s319_s15 }
  0x1e   :  { %p326_p0 = por %p325_p13, %p324_p12 }
  0x20   :  { %p327_p1 = pnand %p326_p0, %p320_p11 }
  0x22   :  { %330 = shalt.err (!%p327_p1)
}
  0x23   :  { %s429_s1 = smov 64   ;;  %s430_s16 = smov 4  }
  0x24   :  { %57 = dma.hbm_to_vmem [thread:$0]  %s562_s3, 256, %s469_s21, [#allocation9], %s429_s1, %s429_s1, %s430_s16  }
  0x25   :  { %s431_s19 = smov [#allocation2]   ;;  %s331_s24 = scalar_lea.hbm %s559_s0, 256 }
  0x26   :  { %s19_s20 = sshll.u32 %s431_s19, 4  ;;  %p332_p2 = scmp.ne.s32.totalorder %s559_s0, %s331_s24  ;;  %s20_s20 = int_to_ptr.vmem [resolvable:$true] %s19_s20 }
  0x27   :  { %p335_p3 = scmp.lt.u32.totalorder %s331_s24, %s559_s0 }
  0x29   :  { %p337_p4 = pnand %p335_p3, %p332_p2 }
  0x2b   :  { %340 = shalt.err (!%p337_p4)
}
  0x2c   :  { %s341_s29 = scalar_lea.vmem %s20_s20, 256  ;;  %p346_p6 = scmp.lt.s32.totalorder %s20_s20, %s20_s20 }
  0x2d   :  { %p342_p5 = scmp.ne.s32.totalorder %s20_s20, %s341_s29  ;;  %p347_p7 = scmp.lt.s32.totalorder %s341_s29, %s341_s29 }
  0x2f   :  { %p348_p8 = por %p347_p7, %p346_p6 }
  0x31   :  { %p349_p9 = pnand %p348_p8, %p342_p5 }
  0x33   :  { %352 = shalt.err (!%p349_p9)
}
  0x34   :  { %s432_s3 = smov 128   ;;  %s433_s21 = smov 8  }
  0x35   :  { %25 = dma.hbm_to_vmem [thread:$0]  %s559_s0, 256, %s20_s20, [#allocation3], %s432_s3, %s432_s3, %s433_s21  }
  0x36   :  { %s434_s7 = smov [#allocation7]   ;;  %s435_s9 = smov [#allocation10]  }
  0x37   :  { %s42_s8 = sshll.u32 %s434_s7, 4  ;;  %s64_s10 = sshll.u32 %s435_s9, 4  ;;  %s43_s8 = int_to_ptr.vmem [resolvable:$true] %s42_s8  ;;  %s65_s10 = int_to_ptr.vmem [resolvable:$true] %s64_s10 }
  0x38   :  { %s353_s13 = scalar_lea.hbm %s561_s2, 16 }
  0x39   :  { %p354_p10 = scmp.ne.s32.totalorder %s561_s2, %s353_s13  ;;  %p357_p11 = scmp.lt.u32.totalorder %s353_s13, %s561_s2 }
  0x3b   :  { %p359_p12 = pnand %p357_p11, %p354_p10 }
  0x3d   :  { %362 = shalt.err (!%p359_p12)
}
  0x3e   :  { %s363_s0 = scalar_lea.vmem %s43_s8, 16  ;;  %s367_s19 = scalar_lea.vmem %s43_s8, 32 }
  0x3f   :  { %p364_p13 = scmp.ne.s32.totalorder %s43_s8, %s363_s0  ;;  %p368_p0 = scmp.lt.s32.totalorder %s43_s8, %s43_s8 }
  0x40   :  { %p369_p1 = scmp.lt.s32.totalorder %s367_s19, %s363_s0 }
  0x42   :  { %p370_p2 = por %p369_p1, %p368_p0 }
  0x44   :  { %p371_p3 = pnand %p370_p2, %p364_p13 }
  0x46   :  { %374 = shalt.err (!%p371_p3)
}
  0x47   :  { %45 = dma.hbm_to_vmem [thread:$0]  %s561_s2, 16, %s43_s8, [#allocation6]  }
  0x48   :  { %s375_s25 = scalar_lea.hbm %s563_s4, 16 }
  0x49   :  { %p376_p4 = scmp.ne.s32.totalorder %s563_s4, %s375_s25  ;;  %p379_p5 = scmp.lt.u32.totalorder %s375_s25, %s563_s4 }
  0x4b   :  { %p381_p6 = pnand %p379_p5, %p376_p4 }
  0x4d   :  { %384 = shalt.err (!%p381_p6)
}
  0x4e   :  { %s385_s3 = scalar_lea.vmem %s65_s10, 16  ;;  %s389_s21 = scalar_lea.vmem %s65_s10, 32 }
  0x4f   :  { %p386_p7 = scmp.ne.s32.totalorder %s65_s10, %s385_s3  ;;  %p390_p8 = scmp.lt.s32.totalorder %s65_s10, %s65_s10 }
  0x50   :  { %p391_p9 = scmp.lt.s32.totalorder %s389_s21, %s385_s3 }
  0x52   :  { %p392_p10 = por %p391_p9, %p390_p8 }
  0x54   :  { %p393_p11 = pnand %p392_p10, %p386_p7 }
  0x56   :  { %396 = shalt.err (!%p393_p11)
}
  0x57   :  { %67 = dma.hbm_to_vmem [thread:$0]  %s563_s4, 16, %s65_s10, [#allocation9]  }
  0x58   :  { %419 = dma.done.wait [#allocation3], 256  }
  0x59   :  { %420 = vsyncadd [#allocation3], 4294967040 }
  0x5a   :  { %421 = dma.done.wait [#allocation6], 32  }
  0x5b   :  { %422 = vsyncadd [#allocation6], 4294967264 }
  0x5c   :  { %423 = dma.done.wait [#allocation9], 272  }
  0x5d   :  { %424 = vsyncadd [#allocation9], 4294967024  ;;  %vm86_vm0 = vcmask 261120   ;;  %v84_v0 = vld [vmem:[#allocation2] sm:$0xff]  ;;  %v85_v1 = vld [vmem:[#allocation2 + $0x8] sm:$0xff]  ;;  %v436_v15 = vmov 0.0  }
  0x5e   :  { %v87_v2 = vsel %vm86_vm0, %v84_v0, 0.0  ;;  %v90_v3 = vsel %vm86_vm0, %v85_v1, 0.0  ;;  %v277_v14 = vld [vmem:[#allocation8] sm:$0xff]   ;;  %257 = vmatprep.subr.bf16.mxu0 %v436_v15  ;;  %v278_v16 = vld [vmem:[#allocation8 + $0x8] sm:$0xff]   ;;  %vm437_vm1 = vmmov 0   ;;  %s438_s4 = smov [#allocation11]  }
  0x5f   :  { %88 = vadd.xlane.f32.xlu0 %v87_v2  ;;  %258 = vmatpush3.bf16.msra.mxu0 %v277_v14  ;;  %v239_v25 = vld [vmem:[#allocation5] ss:$0 sm:$0xff]  ;;  %v240_v29 = vld [vmem:[#allocation7] ss:$0 sm:$0xff]  ;;  %v241_v34 = vld [vmem:[#allocation10] ss:$0 sm:$0xff] }
  0x60   :  { %261 = vmatprep.mubr.msk.bf16.mxu0 %vm437_vm1, %v436_v15  ;;  %259 = vmatprep.subr.bf16.mxu0 %v436_v15  ;;  %s225_s6 = sshll.u32 %s438_s4, 4  ;;  %s226_s6 = int_to_ptr.vmem [resolvable:$true] %s225_s6 }
  0x61   :  { %s397_s7 = scalar_lea.vmem %s226_s6, 128  ;;  %p402_p13 = scmp.lt.s32.totalorder %s226_s6, %s226_s6 }
  0x62   :  { %p398_p12 = scmp.ne.s32.totalorder %s226_s6, %s397_s7  ;;  %p403_p0 = scmp.lt.s32.totalorder %s397_s7, %s397_s7 }
  0x63   :  { %91 = vadd.xlane.f32.xlu0 %v90_v3  ;;  %260 = vmatpush3.bf16.msra.mxu0 %v278_v16 }
  0x64   :  { %p404_p1 = por %p403_p0, %p402_p13 }
  0x66   :  { %p405_p2 = pnand %p404_p1, %p398_p12 }
  0xec   :  { %v89_v4 = vpop.xlane.xlu0 %88 }
  0xed   :  { %v94_v5 = vmul.f32 0.03125, %v89_v4 }
  0xef   :  { %v96_v6 = vsub.f32 %v84_v0, %v94_v5 }
  0xf0   :  { %v92_v7 = vpop.xlane.xlu0 %91 }
  0xf1   :  { %v95_v8 = vmul.f32 0.03125, %v92_v7  ;;  %v98_v9 = vmul.f32 %v96_v6, %v96_v6 }
  0xf3   :  { %v97_v10 = vsub.f32 %v85_v1, %v95_v8  ;;  %v100_v11 = vsel %vm86_vm0, %v98_v9, 0.0 }
  0xf4   :  { %101 = vadd.xlane.f32.xlu1 %v100_v11 }
  0xf5   :  { %v99_v12 = vmul.f32 %v97_v10, %v97_v10 }
  0xf7   :  { %v103_v13 = vsel %vm86_vm0, %v99_v12, 0.0 }
  0xf8   :  { %104 = vadd.xlane.f32.xlu1 %v103_v13 }
 0x181   :  { %v102_v17 = vpop.xlane.xlu1 %101 }
 0x182   :  { %v106_v18 = vmul.f32 0.03125, %v102_v17 }
 0x184   :  { %v108_v19 = vadd.f32 1e-05, %v106_v18 }
 0x185   :  { %v105_v20 = vpop.xlane.xlu1 %104 }
 0x186   :  { %279 = vrsqrt.f32 %v108_v19  ;;  %v107_v21 = vmul.f32 0.03125, %v105_v20 }
 0x188   :  { %v109_v22 = vadd.f32 1e-05, %v107_v21 }
 0x18a   :  { %281 = vrsqrt.f32 %v109_v22 }
 0x190   :  { %v280_v23 = vpop.eup %279 }
 0x191   :  { %v112_v24 = vmul.f32 %v280_v23, %v96_v6 }
 0x193   :  { %v121_v28 = vmul.f32 %v239_v25, %v112_v24 }
 0x194   :  { %v282_v26 = vpop.eup %281 }
 0x195   :  { %v113_v27 = vmul.f32 %v282_v26, %v97_v10  ;;  %v130_v31 = vadd.f32 %v240_v29, %v121_v28 }
 0x197   :  { %v122_v30 = vmul.f32 %v239_v25, %v113_v27 }
 0x199   :  { %v131_v32 = vadd.f32 %v240_v29, %v122_v30 }
 0x19b   :  { %v132_v33 = vpack.c.bf16 %v131_v32, %v130_v31 }
 0x19d   :  { %262 = vmatmul.mubr.msk.bf16.vlgmr.msra.gmra.mrb[0].mxu0 %vm86_vm0, %v132_v33 }
 0x270   :  { %v193_v35 = vpop.f32.mrb[0].mxu0 }
 0x271   :  { %v194_v36 = vadd.f32 %v241_v34, %v193_v35  ;;  %v263_v37 = vpop.f32.mrb[1].mxu0 }
 0x272   :  { %v196_v38 = vpop.f32.mrb[2].mxu0 }
 0x273   :  { %v202_v39 = vmul.f32 0.70710677, %v194_v36  ;;  %v197_v40 = vadd.f32 %v241_v34, %v196_v38  ;;  %v264_v41 = vpop.f32.mrb[3].mxu0  ;;  %v200_v46 = vmul.f32 0.5, %v194_v36 }
 0x275   :  { %283 = verf.f32 %v202_v39  ;;  %v203_v42 = vmul.f32 0.70710677, %v197_v40  ;;  %v201_v47 = vmul.f32 0.5, %v197_v40 }
 0x277   :  { %285 = verf.f32 %v203_v42 }
 0x27f   :  { %v284_v43 = vpop.eup %283 }
 0x280   :  { %v206_v44 = vadd.f32 1.0, %v284_v43 }
 0x281   :  { %v286_v45 = vpop.eup %285 }
 0x282   :  { %v207_v48 = vadd.f32 1.0, %v286_v45  ;;  %v208_v49 = vmul.f32 %v206_v44, %v200_v46 }
 0x284   :  { %v209_v50 = vmul.f32 %v207_v48, %v201_v47 }
 0x286   :  { %v252_v51 = vpack.c.bf16 %v209_v50, %v208_v49 }
 0x288   :  { %253 = vst [vmem:[#allocation11] sm:$0xff] %v252_v51  }
 0x289   :  { %408 = shalt.err (!%p405_p2)
}
 0x28a   :  { %s409_s10 = scalar_lea.hbm %s564_s5, 128 }
 0x28b   :  { %p410_p3 = scmp.ne.s32.totalorder %s564_s5, %s409_s10  ;;  %p413_p4 = scmp.lt.u32.totalorder %s409_s10, %s564_s5 }
 0x28d   :  { %p415_p5 = pnand %p413_p4, %p410_p3 }
 0x28f   :  { %418 = shalt.err (!%p415_p5)
}
 0x290   :  { %231 = dma.vmem_to_hbm [thread:$0]  %s226_s6, 128, %s564_s5, [#allocation4], %s429_s1, %s429_s1, %s430_s16  }
 0x291   :  { %425 = dma.done.wait [#allocation4], 128  }
 0x292   :  { %426 = vsyncadd [#allocation4], 4294967168 }
 0x293   :  { %235 = vsyncpa [#allocation3], 1 }
 0x294   :  { %236 = vsyncpa [#allocation6], 1 }
 0x295   :  { %237 = vsyncpa [#allocation9], 1 }
 0x296   :  { %238 = vsyncpa [#allocation4], 1 }

// kernel: block_forward.6
= control target key start
LH: loop header
LB: loop body
LE: loop exit
PB: predicated region body
PF: predicated region fallthrough
CT: control target
= control target key end

     0   :  { %s2470_s0 = inlined_call_operand.hbm [shape: bf16[2,8,64], index: 0, kind: input, shape index: {}]   ;;  %s2471_s1 = inlined_call_operand.hbm [shape: bf16[2,8,32], index: 1, kind: input, shape index: {}]   ;;  %s2472_s2 = inlined_call_operand.hbm [shape: bf16[8,32], index: 2, kind: input, shape index: {}]   ;;  %s2473_s3 = inlined_call_operand.hbm [shape: bf16[8,32], index: 3, kind: input, shape index: {}]   ;;  %s2474_s4 = inlined_call_operand.hbm [shape: f32[32,32], index: 4, kind: input, shape index: {}]   ;;  %s2475_s5 = inlined_call_operand.hbm [shape: bf16[32,32], index: 5, kind: input, shape index: {}]   ;;  %s2476_s6 = inlined_call_operand.hbm [shape: bf16[32,32], index: 6, kind: input, shape index: {}]   ;;  %s2477_s7 = inlined_call_operand.hbm [shape: f32[1,32], index: 7, kind: input, shape index: {}]   ;;  %s2478_s8 = inlined_call_operand.hbm [shape: bf16[2,8,32], index: 8, kind: output, shape index: {0}]   ;;  %s2479_s9 = inlined_call_operand.hbm [shape: f32[2,8,32], index: 9, kind: output, shape index: {1}]   ;;  %s2480_s10 = inlined_call_operand.hbm [shape: f32[2,8,32], index: 10, kind: output, shape index: {2}]  }
   0x1   :  { %2488 = sst [smem:[#allocation31_spill]] %s2472_s2 }
   0x2   :  { %2489 = sst [smem:[#allocation32_spill]] %s2473_s3 }
   0x3   :  { %2490 = sst [smem:[#allocation33_spill]] %s2474_s4 }
   0x4   :  { %2491 = sst [smem:[#allocation34_spill]] %s2475_s5 }
   0x5   :  { %2492 = sst [smem:[#allocation35_spill]] %s2476_s6 }
   0x6   :  { %2493 = sst [smem:[#allocation36_spill]] %s2477_s7 }
   0x7   :  { %16 = vsyncpa [#allocation5], 0 }
   0x8   :  { %18 = vsyncpa [#allocation5 + $0x1], 0 }
   0x9   :  { %19 = vsyncpa [#allocation8], 0 }
   0xa   :  { %21 = vsyncpa [#allocation8 + $0x1], 0 }
   0xb   :  { %22 = vsyncpa [#allocation11], 0 }
   0xc   :  { %23 = vsyncpa [#allocation14], 0 }
   0xd   :  { %24 = vsyncpa [#allocation17], 0 }
   0xe   :  { %25 = vsyncpa [#allocation6], 0 }
   0xf   :  { %27 = vsyncpa [#allocation6 + $0x1], 0 }
  0x10   :  { %28 = vsyncpa [#allocation20], 0 }
  0x11   :  { %30 = vsyncpa [#allocation20 + $0x1], 0  ;;  %s1988_s13 = smov 0   ;;  %s1990_s14 = smov 0  }
  0x12   :  { %s1992_s15 = smov 0   ;;  %s1994_s16 = smov 0  }
  0x13 LB: > { %s1909_s17 = smov [#allocation9]   ;;  %s2009_s19 = sadd.s32 4294967295, %s1907_s16   ;;  %s1907_s16 = sphi %s1994_s16, %s2530_s16   ;;  %s1903_s15 = sphi %s1992_s15, %s2529_s15   ;;  %s1899_s14 = sphi %s1990_s14, %s2528_s14   ;;  %s1895_s13 = sphi %s1988_s13, %s2527_s13  }
  0x14   : > { %s310_s18 = sshll.u32 %s1909_s17, 4  ;;  %p1260_p0 = scmp.ge.s32.totalorder %s1907_s16, 1  ;;  %s311_s18 = int_to_ptr.vmem [resolvable:$true] %s310_s18 }
  0x15   : > { %p2481_p1 = scmp.eq.s32.totalorder %s2009_s19, 0  ;;  %p297_p2 = scmp.lt.s32.totalorder %s1907_s16, 3 }
  0x16   : > { %s1910_s21 = smov [#allocation10]   ;;  %s1911_s23 = smov [#allocation13]  }
  0x17   : > { %p2014_p3 = pnand %p1260_p0, %p297_p2  ;;  %s321_s22 = sshll.u32 %s1910_s21, 4  ;;  %s2021_s22 = int_to_ptr.vmem [resolvable:$true] %s321_s22 }
  0x18   : > { %s344_s24 = sshll.u32 %s1911_s23, 4  ;;  %s2496_s2 = sld [smem:[#allocation31_spill]]  ;;  %s2029_s24 = int_to_ptr.vmem [resolvable:$true] %s344_s24 }
  0x19   : > { %s2494_s20 = scalar_select %p2014_p3, 1, 0 }
  0x1a   : > { %p1411_p5 = pneg %p2014_p3 }
  0x1c   : > { %p2025_p6 = pnand %p1411_p5, %p2481_p1 }
  0x1e   : > { %s1533_s28 = scalar_lea.hbm %s2496_s2, 64  ;;  %p2039_p8 = pneg %p2025_p6 }
  0x1f   : > { %p1534_p7 = scmp.ne.s32.totalorder %s2496_s2, %s1533_s28  ;;  %p1540_p11 = scmp.lt.u32.totalorder %s1533_s28, %s2496_s2 }
  0x21   : > { %p1536_p9 = pnand %p2039_p8, %p1534_p7 }
  0x23   : > { %p1537_p10 = pneg %p1536_p9 }
  0x25   : > { %p1542_p12 = pnand %p1540_p11, %p1537_p10 }
  0x27   : > { %1545 = shalt.err (!%p1542_p12)
}
  0x28   : > { %s1546_s21 = scalar_lea.vmem %s311_s18, 64  ;;  %p1554_p5 = scmp.lt.s32.totalorder %s311_s18, %s311_s18 }
  0x29   : > { %p1547_p13 = scmp.ne.s32.totalorder %s311_s18, %s1546_s21  ;;  %p1555_p4 = scmp.lt.s32.totalorder %s1546_s21, %s1546_s21 }
  0x2b   : > { %p1549_p0 = pnand %p1547_p13, %p2039_p8  ;;  %p1556_p1 = por %p1555_p4, %p1554_p5 }
  0x2d   : > { %p1550_p2 = pneg %p1549_p0 }
  0x2f   : > { %p1557_p3 = pnand %p1556_p1, %p1550_p2 }
  0x31   : > { %1560 = shalt.err (!%p1557_p3)
}
  0x32   : > { %1414 = dma.hbm_to_vmem [thread:$0]  (!%p2025_p6), %s2496_s2, 64, %s311_s18, [#allocation8]  }
  0x33   : > { %s2498_s3 = sld [smem:[#allocation32_spill]] }
  0x39   : > { %s1561_s29 = scalar_lea.hbm %s2498_s3, 64 }
  0x3a   : > { %p1562_p7 = scmp.ne.s32.totalorder %s2498_s3, %s1561_s29  ;;  %p1568_p1 = scmp.lt.u32.totalorder %s1561_s29, %s2498_s3 }
  0x3c   : > { %p1564_p9 = pnand %p1562_p7, %p2039_p8 }
  0x3e   : > { %p1565_p4 = pneg %p1564_p9 }
  0x40   : > { %p1570_p3 = pnand %p1568_p1, %p1565_p4 }
  0x42   : > { %1573 = shalt.err (!%p1570_p3)
}
  0x43   : > { %s1574_s18 = scalar_lea.vmem %s2021_s22, 64  ;;  %p1582_p13 = scmp.lt.s32.totalorder %s2021_s22, %s2021_s22 }
  0x44   : > { %p1575_p10 = scmp.ne.s32.totalorder %s2021_s22, %s1574_s18  ;;  %p1583_p0 = scmp.lt.s32.totalorder %s1574_s18, %s1574_s18 }
  0x46   : > { %p1577_p11 = pnand %p1575_p10, %p2039_p8  ;;  %p1584_p2 = por %p1583_p0, %p1582_p13 }
  0x48   : > { %p1578_p12 = pneg %p1577_p11 }
  0x4a   : > { %p1585_p5 = pnand %p1584_p2, %p1578_p12 }
  0x4c   : > { %1588 = shalt.err (!%p1585_p5)
}
  0x4d   : > { %1417 = dma.hbm_to_vmem [thread:$0]  (!%p2025_p6), %s2498_s3, 64, %s2021_s22, [#allocation11]  }
  0x4e   : > { %s2499_s5 = sld [smem:[#allocation34_spill]] }
  0x54   : > { %s1589_s29 = scalar_lea.hbm %s2499_s5, 256 }
  0x55   : > { %p1590_p7 = scmp.ne.s32.totalorder %s2499_s5, %s1589_s29  ;;  %p1596_p1 = scmp.lt.u32.totalorder %s1589_s29, %s2499_s5 }
  0x57   : > { %p1592_p9 = pnand %p1590_p7, %p2039_p8 }
  0x59   : > { %p1593_p4 = pneg %p1592_p9 }
  0x5b   : > { %p1598_p3 = pnand %p1596_p1, %p1593_p4 }
  0x5d   : > { %1601 = shalt.err (!%p1598_p3)
}
  0x5e   : > { %s1602_s22 = scalar_lea.vmem %s2029_s24, 256  ;;  %p1610_p13 = scmp.lt.s32.totalorder %s2029_s24, %s2029_s24 }
  0x5f   : > { %p1603_p10 = scmp.ne.s32.totalorder %s2029_s24, %s1602_s22  ;;  %p1611_p0 = scmp.lt.s32.totalorder %s1602_s22, %s1602_s22 }
  0x61   : > { %p1605_p11 = pnand %p1603_p10, %p2039_p8  ;;  %p1612_p2 = por %p1611_p0, %p1610_p13 }
  0x63   : > { %p1606_p12 = pneg %p1605_p11 }
  0x65   : > { %p1613_p5 = pnand %p1612_p2, %p1606_p12 }
  0x67   : > { %1616 = shalt.err (!%p1613_p5)
}
  0x68   : > { %s2483_s18 = smov 64   ;;  %s2484_s23 = smov 4  }
  0x69   : > { %1423 = dma.hbm_to_vmem [thread:$0]  (!%p2025_p6), %s2499_s5, 256, %s2029_s24, [#allocation14], %s2483_s18, %s2483_s18, %s2484_s23  }
  0x6a   : > { %s1914_s28 = smov [#allocation12]   ;;  %s2500_s4 = sld [smem:[#allocation33_spill]] }
  0x6b   : > { %s331_s29 = sshll.u32 %s1914_s28, 4  ;;  %s332_s29 = int_to_ptr.vmem [resolvable:$true] %s331_s29 }
  0x70   : > { %s1617_s17 = scalar_lea.hbm %s2500_s4, 512 }
  0x71   : > { %p1618_p7 = scmp.ne.s32.totalorder %s2500_s4, %s1617_s17  ;;  %p1624_p1 = scmp.lt.u32.totalorder %s1617_s17, %s2500_s4 }
  0x73   : > { %p1620_p9 = pnand %p1618_p7, %p2039_p8 }
  0x75   : > { %p1621_p4 = pneg %p1620_p9 }
  0x77   : > { %p1626_p3 = pnand %p1624_p1, %p1621_p4 }
  0x79   : > { %1629 = shalt.err (!%p1626_p3)
}
  0x7a   : > { %s1630_s24 = scalar_lea.vmem %s332_s29, 512  ;;  %p1638_p13 = scmp.lt.s32.totalorder %s332_s29, %s332_s29 }
  0x7b   : > { %p1631_p10 = scmp.ne.s32.totalorder %s332_s29, %s1630_s24  ;;  %p1639_p0 = scmp.lt.s32.totalorder %s1630_s24, %s1630_s24 }
  0x7d   : > { %p1633_p11 = pnand %p1631_p10, %p2039_p8  ;;  %p1640_p2 = por %p1639_p0, %p1638_p13 }
  0x7f   : > { %p1634_p12 = pneg %p1633_p11 }
  0x81   : > { %p1641_p5 = pnand %p1640_p2, %p1634_p12 }
  0x83   : > { %1644 = shalt.err (!%p1641_p5)
}
  0x84   : > { %s1915_s26 = smov 128   ;;  %s1916_s27 = smov 8  }
  0x85   : > { %1420 = dma.hbm_to_vmem [thread:$0]  (!%p2025_p6), %s2500_s4, 512, %s332_s29, [#allocation11], %s1915_s26, %s1915_s26, %s1916_s27  }
  0x86   : > { %s1917_s28 = smov [#allocation15]   ;;  %s1918_s12 = smov [#allocation16]  }
  0x87   : > { %s357_s30 = sshll.u32 %s1917_s28, 4  ;;  %s371_s17 = sshll.u32 %s1918_s12, 4  ;;  %s358_s30 = int_to_ptr.vmem [resolvable:$true] %s357_s30  ;;  %s2122_s17 = int_to_ptr.vmem [resolvable:$true] %s371_s17 }
  0x88   : > { %s2501_s6 = sld [smem:[#allocation35_spill]] }
  0x8e   : > { %s1645_s24 = scalar_lea.hbm %s2501_s6, 256 }
  0x8f   : > { %p1646_p7 = scmp.ne.s32.totalorder %s2501_s6, %s1645_s24  ;;  %p1652_p1 = scmp.lt.u32.totalorder %s1645_s24, %s2501_s6 }
  0x91   : > { %p1648_p9 = pnand %p1646_p7, %p2039_p8 }
  0x93   : > { %p1649_p4 = pneg %p1648_p9 }
  0x95   : > { %p1654_p3 = pnand %p1652_p1, %p1649_p4 }
  0x97   : > { %1657 = shalt.err (!%p1654_p3)
}
  0x98   : > { %s1658_s26 = scalar_lea.vmem %s358_s30, 256  ;;  %p1666_p13 = scmp.lt.s32.totalorder %s358_s30, %s358_s30 }
  0x99   : > { %p1659_p10 = scmp.ne.s32.totalorder %s358_s30, %s1658_s26  ;;  %p1667_p0 = scmp.lt.s32.totalorder %s1658_s26, %s1658_s26 }
  0x9b   : > { %p1661_p11 = pnand %p1659_p10, %p2039_p8  ;;  %p1668_p2 = por %p1667_p0, %p1666_p13 }
  0x9d   : > { %p1662_p12 = pneg %p1661_p11 }
  0x9f   : > { %p1669_p5 = pnand %p1668_p2, %p1662_p12 }
  0xa1   : > { %1672 = shalt.err (!%p1669_p5)
}
  0xa2   : > { %s2502_s18 = smov 4   ;;  %s2503_s23 = smov 64  }
  0xa3   : > { %1426 = dma.hbm_to_vmem [thread:$0]  (!%p2025_p6), %s2501_s6, 256, %s358_s30, [#allocation14], %s2503_s23, %s2503_s23, %s2502_s18  }
  0xa4   : > { %s2504_s7 = sld [smem:[#allocation36_spill]] }
  0xaa   : > { %s1673_s21 = scalar_lea.hbm %s2504_s7, 16 }
  0xab   : > { %p1674_p7 = scmp.ne.s32.totalorder %s2504_s7, %s1673_s21  ;;  %p1680_p1 = scmp.lt.u32.totalorder %s1673_s21, %s2504_s7 }
  0xad   : > { %p1676_p9 = pnand %p1674_p7, %p2039_p8 }
  0xaf   : > { %p1677_p4 = pneg %p1676_p9 }
  0xb1   : > { %p1682_p3 = pnand %p1680_p1, %p1677_p4 }
  0xb3   : > { %1685 = shalt.err (!%p1682_p3)
}
  0xb4   : > { %s1686_s30 = scalar_lea.vmem %s2122_s17, 16  ;;  %s1693_s26 = scalar_lea.vmem %s2122_s17, 32 }
  0xb5   : > { %p1687_p10 = scmp.ne.s32.totalorder %s2122_s17, %s1686_s30  ;;  %p1694_p13 = scmp.lt.s32.totalorder %s2122_s17, %s2122_s17 }
  0xb6   : > { %p1695_p0 = scmp.lt.s32.totalorder %s1693_s26, %s1686_s30 }
  0xb7   : > { %p1689_p11 = pnand %p1687_p10, %p2039_p8 }
  0xb8   : > { %p1696_p2 = por %p1695_p0, %p1694_p13 }
  0xb9   : > { %p1690_p12 = pneg %p1689_p11 }
  0xbb   : > { %p1697_p5 = pnand %p1696_p2, %p1690_p12 }
  0xbd   : > { %1700 = shalt.err (!%p1697_p5)
}
  0xbe   : > { %1429 = dma.hbm_to_vmem [thread:$0]  (!%p2025_p6), %s2504_s7, 16, %s2122_s17, [#allocation17]  }
  0xbf   : > { %s2485_s25 = sadd.s32 4294967294, %s1907_s16   ;;  %s2171_s11 = sadd.s32 1, %s1907_s16  }
  0xc0   : > { %s40_s27 = ssub.s32 %s1907_s16, %s2171_s11  ;;  %s43_s3 = sadd.s32 1, %s1903_s15 }
  0xc1   : > { %p41_p8 = scmp.eq.s32.totalorder %s40_s27, 0  ;;  %p50_p7 = scmp.ne.s32.totalorder %s1903_s15, %s1899_s14 }
  0xc2   : > { %p51_p9 = scmp.eq.s32.totalorder %s1907_s16, 0  ;;  %p56_p4 = scmp.ne.s32.totalorder %s1899_s14, %s1895_s13 }
  0xc3   : > { %s2182_s28 = scalar_select %p41_p8, %s1903_s15, %s43_s3  }
  0xc4   : > { %p2184_p1 = por %p51_p9, %p50_p7  ;;  %p2507_p3 = scmp.eq.s32.totalorder %s2009_s19, 0 }
  0xc5   : > { %2505 = sst [smem:[#allocation30_spill]] %s2182_s28  ;;  %p232_p10 = scmp.eq.s32.totalorder %s2009_s19, 1 }
  0xc6   : > { %p2190_p6 = por %p2507_p3, %p56_p4  ;;  %p238_p11 = scmp.eq.s32.totalorder %s2485_s25, 1 }
  0xc7   : > { %p1453_p12 = scmp.lt.s32.totalorder %s1907_s16, 2  ;;  %s382_s21 = sand.u32 1, %s1903_s15  }
  0xc8   : > { %s2508_s17 = scalar_select %p2190_p6, 1, 0 }
  0xc9   : > { %p2199_p13 = por %p232_p10, %p50_p7  ;;  %p2203_p0 = por %p238_p11, %p56_p4 }
  0xca   : > { %s2207_s2 = sshll.u32 %s382_s21, 2  ;;  %s1269_s29 = sshll.u32 %s1907_s16, 6 }
  0xcb   : > { %s2509_s22 = scalar_select %p2199_p13, 1, 0 }
  0xcc   : > { %s2510_s24 = scalar_select %p2203_p0, 1, 0 }
  0xcd   : > { %s2213_s18 = scalar_lea.hbm %s2470_s0, %s1269_s29  ;;  %s386_s23 = scalar_lea.vmem [#allocation4], %s2207_s2 }
  0xce   : > { %s393_s27 = sshll.u32 %s386_s23, 4  ;;  %p2220_p2 = pnand %p1453_p12, %p2184_p1  ;;  %s2216_s27 = int_to_ptr.vmem [resolvable:$true] %s393_s27 }
  0xcf   : > { %s2227_s30 = scalar_lea.hbm %s2471_s1, %s1269_s29  ;;  %s400_s26 = sand.u32 1, %s1907_s16  }
  0xd0   : > { %s383_s5 = scalar_lea.sflag [#allocation5], %s382_s21  ;;  %s1701_s6 = scalar_lea.hbm %s2213_s18, 64 }
  0xd1   : > { %p1702_p5 = scmp.ne.s32.totalorder %s2213_s18, %s1701_s6  ;;  %p1703_p8 = pneg %p2220_p2 }
  0xd2   : > { %s1706_s7 = scalar_lea.hbm %s2470_s0, 128  ;;  %p1707_p4 = scmp.lt.u32.totalorder %s2213_s18, %s2470_s0 }
  0xd3   : > { %p1704_p7 = pnand %p1703_p8, %p1702_p5  ;;  %p1708_p1 = scmp.lt.u32.totalorder %s1706_s7, %s1701_s6 }
  0xd4   : > { %p1710_p10 = scmp.lt.u32.totalorder %s1701_s6, %s2213_s18 }
  0xd5   : > { %p1705_p9 = pneg %p1704_p7  ;;  %p1709_p3 = por %p1708_p1, %p1707_p4 }
  0xd7   : > { %p1711_p11 = por %p1710_p10, %p1709_p3 }
  0xd9   : > { %p1712_p12 = pnand %p1711_p11, %p1705_p9 }
  0xdb   : > { %1715 = shalt.err (!%p1712_p12)
}
  0xdc   : > { %s1716_s25 = scalar_lea.vmem %s2216_s27, 64  ;;  %s1919_s21 = smov [#allocation4]  }
  0xdd   : > { %p1717_p5 = scmp.ne.s32.totalorder %s2216_s27, %s1716_s25  ;;  %s1721_s29 = sshll.u32 %s1919_s21, 4  ;;  %s1722_s29 = int_to_ptr.vmem [resolvable:$false] %s1721_s29 }
  0xde   : > { %s1723_s28 = scalar_lea.vmem %s1722_s29, 128  ;;  %p1724_p13 = scmp.lt.s32.totalorder %s2216_s27, %s1722_s29 }
  0xdf   : > { %p1719_p7 = pnand %p1717_p5, %p1703_p8  ;;  %p1725_p4 = scmp.lt.s32.totalorder %s1723_s28, %s1716_s25 }
  0xe1   : > { %p1720_p0 = pneg %p1719_p7  ;;  %p1726_p1 = por %p1725_p4, %p1724_p13 }
  0xe3   : > { %p1727_p3 = pnand %p1726_p1, %p1720_p0 }
  0xe5   : > { %1730 = shalt.err (!%p1727_p3)
}
  0xe6   : > { %1433 = dma.hbm_to_vmem [thread:$0]  (!%p2220_p2), %s2213_s18, 64, %s2216_s27, %s383_s5  }
  0xe7   : > { %s404_s6 = scalar_lea.vmem [#allocation7], %s2207_s2  ;;  %s401_s12 = scalar_lea.sflag [#allocation8], %s400_s26 }
  0xe8   : > { %s411_s7 = sshll.u32 %s404_s6, 4  ;;  %s1731_s23 = scalar_lea.hbm %s2227_s30, 64  ;;  %s412_s7 = int_to_ptr.vmem [resolvable:$true] %s411_s7 }
  0xe9   : > { %p1732_p13 = scmp.ne.s32.totalorder %s2227_s30, %s1731_s23  ;;  %s1736_s21 = scalar_lea.hbm %s2471_s1, 128 }
  0xea   : > { %p1737_p10 = scmp.lt.u32.totalorder %s2227_s30, %s2471_s1  ;;  %p1738_p11 = scmp.lt.u32.totalorder %s1736_s21, %s1731_s23 }
  0xeb   : > { %p1734_p0 = pnand %p1732_p13, %p1703_p8  ;;  %p1740_p5 = scmp.lt.u32.totalorder %s1731_s23, %s2227_s30 }
  0xec   : > { %p1739_p12 = por %p1738_p11, %p1737_p10 }
  0xed   : > { %p1735_p9 = pneg %p1734_p0 }
  0xee   : > { %p1741_p7 = por %p1740_p5, %p1739_p12 }
  0xf0   : > { %p1742_p4 = pnand %p1741_p7, %p1735_p9 }
  0xf2   : > { %1745 = shalt.err (!%p1742_p4)
}
  0xf3   : > { %s1746_s5 = scalar_lea.vmem %s412_s7, 64  ;;  %s1920_s2 = smov [#allocation7]  }
  0xf4   : > { %p1747_p1 = scmp.ne.s32.totalorder %s412_s7, %s1746_s5  ;;  %s1751_s18 = sshll.u32 %s1920_s2, 4  ;;  %s1752_s18 = int_to_ptr.vmem [resolvable:$false] %s1751_s18 }
  0xf5   : > { %s1753_s27 = scalar_lea.vmem %s1752_s18, 128  ;;  %p1754_p0 = scmp.lt.s32.totalorder %s412_s7, %s1752_s18 }
  0xf6   : > { %p1749_p3 = pnand %p1747_p1, %p1703_p8  ;;  %p1755_p6 = scmp.lt.s32.totalorder %s1753_s27, %s1746_s5 }
  0xf8   : > { %p1750_p13 = pneg %p1749_p3  ;;  %p1756_p10 = por %p1755_p6, %p1754_p0 }
  0xfa   : > { %p1757_p11 = pnand %p1756_p10, %p1750_p13 }
  0xfc   : > { %1760 = shalt.err (!%p1757_p11)
}
  0xfd   : > { %1436 = dma.hbm_to_vmem [thread:$0]  (!%p2220_p2), %s2227_s30, 64, %s412_s7, %s401_s12  }
  0xfe   : > { %p2512_p9 = scmp.ne.s32.totalorder %s2494_s20, 0 }
  0xff   : > { %s2280_s26 = sand.u32 (!%p2512_p9), 1, %s1899_s14   ;;  %p2513_p6 = scmp.ne.s32.totalorder (!%p2512_p9), %s2508_s17, 0 }
 0x100   : > { %420 = sbr.rel (%p2512_p9) target bundleno = 1164 (0x48c), region = 52  ;;  %s2283_s6 = sshll.u32 (!%p2512_p9), %s2280_s26, 2 }
 0x101   : > { %s423_s23 = scalar_lea.sflag (!%p2512_p9), [#allocation5], %s2280_s26  ;;  %s426_s4 = scalar_lea.vmem (!%p2512_p9), [#allocation4], %s2283_s6 }
 0x107   : > { %1862 = dma.done.wait (%p2513_p6), %s423_s23, 64  }
 0x108   : > { %1864 = vsyncadd (%p2513_p6), %s423_s23, 4294967232  ;;  %s431_s20 = sand.u32 1, %s2009_s19   ;;  %s435_s30 = scalar_lea.vmem [#allocation7], %s2283_s6 }
 0x109   : > { %s432_s3 = scalar_lea.sflag [#allocation8], %s431_s20 }
 0x10a   : > { %1866 = dma.done.wait (%p2513_p6), %s432_s3, 64  }
 0x10b   : > { %1868 = vsyncadd (%p2513_p6), %s432_s3, 4294967232  ;;  %p2514_p2 = scmp.eq.s32.totalorder %s2009_s19, 0 }
 0x10d   : > { %1870 = dma.done.wait (%p2514_p2), [#allocation8], 64   ;;  %p2515_p8 = pmov %p2514_p2 }
 0x10e   : > { %p2516_p12 = pmov %p2514_p2 }
 0x10f   : > { %1872 = vsyncadd (%p2515_p8), [#allocation8], 4294967232 }
 0x110   : > { %1874 = dma.done.wait (%p2516_p12), [#allocation11], 576   ;;  %p2517_p5 = pmov %p2514_p2 }
 0x111   : > { %p2518_p7 = pmov %p2514_p2 }
 0x112   : > { %1876 = vsyncadd (%p2517_p5), [#allocation11], 4294966720 }
 0x113   : > { %1878 = dma.done.wait (%p2518_p7), [#allocation14], 512   ;;  %p2519_p4 = pmov %p2514_p2 }
 0x114   : > { %p2520_p1 = pmov %p2514_p2 }
 0x115   : > { %1880 = vsyncadd (%p2519_p4), [#allocation14], 4294966784 }
 0x116   : > { %1882 = dma.done.wait (%p2520_p1), [#allocation17], 16   ;;  %p2521_p3 = pmov %p2520_p1 }
 0x117   : > { %v512_v0 = vld [vmem:[%s435_s30] sm:$0xf]  ;;  %v655_v1 = vld [vmem:[%s426_s4] sm:$0xf]  ;;  %v513_v3 = vld [vmem:[#allocation9] sm:$0xf] }
 0x118   : > { %1884 = vsyncadd (%p2521_p3), [#allocation17], 4294967280  ;;  %514 = vxpose.xlu0.c.b16.start.end [1/1] (short) (narrow) %v512_v0, 32  ;;  %v2315_v2 = vunpack.c.l.bf16 %v655_v1  ;;  %vm537_vm0 = vcmask 1043456   ;;  %v598_v4 = vld [vmem:[#allocation10] sm:$0xf] }
 0x119   : > { %1375 = vmatprep.subr.msk.bf16.mxu0 %vm537_vm0, %v513_v3  ;;  %1376 = vmatprep.subr.msk.bf16.mxu1 %vm537_vm0, %v598_v4  ;;  %v539_v6 = vsel %vm537_vm0, %v513_v3, 0  ;;  %v600_v7 = vsel %vm537_vm0, %v598_v4, 0  ;;  %s1921_s17 = smov 88   ;;  %s1922_s7 = smov 80   ;;  %vm530_vm1 = vcmask 64512   ;;  %v1928_v23 = vmov 0.0  }
 0x11a   : > { %v657_v5 = vmul.f32 %v2315_v2, %v2315_v2  ;;  %1332 = vmatpush3.bf16.msra.mxu0 %v539_v6  ;;  %1338 = vmatpush3.bf16.msra.mxu1 %v600_v7  ;;  %s1923_s12 = smov 72   ;;  %s1924_s25 = smov 96   ;;  %vm1929_vm2 = vmmov 0   ;;  %v592_v50 = vld [vmem:[#allocation12 + $0x10] sm:$0xff]  ;;  %v590_v51 = vld [vmem:[#allocation12] sm:$0xff]  ;;  %v593_v54 = vld [vmem:[#allocation12 + $0x18] sm:$0xff] }
 0x11b   : > { %s1925_s21 = smov 112   ;;  %s1926_s29 = smov 120   ;;  %1343 = vmatprep.subr.bf16.mxu0 %v1928_v23  ;;  %1351 = vmatprep.subr.bf16.mxu1 %v1928_v23  ;;  %v591_v59 = vld [vmem:[#allocation12 + $0x8] sm:$0xff]  ;;  %vm673_vm3 = vcmask 60416   ;;  %vm702_vm4 = vcmask 126016   ;;  %vm731_vm5 = vcmask 191616  }
 0x11c   : > { %692 = vrot.lane.b32.xlu1 %v657_v5, %s1921_s17  ;;  %s1927_s28 = smov 104   ;;  %v658_v22 = vsel %vm530_vm1, %v657_v5, 0.0  ;;  %vm760_vm6 = vcmask 257216   ;;  %vm776_vm7 = vcmask 261120   ;;  %s1282_s5 = sshll.u32 %s2280_s26, 3 }
 0x11d   : > { %s2363_s2 = scalar_lea.vmem [#allocation21], %s1282_s5  ;;  %s503_s18 = scalar_lea.vmem [#allocation19], %s1282_s5 }
 0x11e   : > { %s1305_s27 = sshll.u32 %s2009_s19, 7  ;;  %s1035_s30 = sshll.u32 %s503_s18, 4  ;;  %s1036_s30 = int_to_ptr.vmem [resolvable:$true] %s1035_s30 }
 0x11f   : > { %s2376_s3 = scalar_lea.hbm %s2479_s9, %s1305_s27  ;;  %s2380_s17 = scalar_lea.sflag [#allocation20], %s431_s20 }
 0x120   : > { %721 = vrot.lane.b32.xlu1 %v657_v5, %s1922_s7  ;;  %s1761_s7 = scalar_lea.vmem %s1036_s30, 128  ;;  %p2522_p0 = scmp.ne.s32.totalorder %s2509_s22, 0 }
 0x121   : > { %p1762_p13 = scmp.ne.s32.totalorder %s1036_s30, %s1761_s7 }
 0x123   : > { %p1763_p10 = pnand %p1762_p13, %p2522_p0 }
 0x124   : > { %750 = vrot.lane.b32.xlu1 %v657_v5, %s1923_s12  ;;  %s1930_s12 = smov [#allocation19]  }
 0x125   : > { %663 = vrot.lane.b32.xlu0 %v657_v5, %s1924_s25  ;;  %p1764_p11 = pneg %p1763_p10 }
 0x128   : > { %714 = vrot.lane.b32.xlu1 %v657_v5, %s1925_s21 }
 0x129   : > { %685 = vrot.lane.b32.xlu0 %v657_v5, %s1926_s29 }
 0x17e   : > { %v522_v8 = vpop.trf.xlu0 }
 0x17f   : > { %1333 = vmatprep.mubr.msk.bf16.mxu0 %vm530_vm1, %v522_v8  ;;  %1339 = vmatprep.mubr.msk.bf16.mxu1 %vm530_vm1, %v522_v8 }
 0x182   : > { %v523_v9 = vpop.trf.xlu0 }
 0x183   : > { %1334 = vmatmul.mubr.msk.bf16.vlgmr.msra.gmra.mrb[0].mxu0 %vm530_vm1, %v523_v9  ;;  %1340 = vmatmul.mubr.msk.bf16.vlgmr.msra.gmra.mrb[0].mxu1 %vm530_vm1, %v523_v9 }
 0x184   : > { %1355 = vmatprep.mubr.msk.bf16.mxu1 %vm1929_vm2, %v1928_v23  ;;  %1347 = vmatprep.mubr.msk.bf16.mxu0 %vm1929_vm2, %v1928_v23 }
 0x18e   : > { %v693_v10 = vpop.permute.xlu1 %692 }
 0x18f   : > { %v695_v11 = vsel %vm530_vm1, %v693_v10, 0.0 }
 0x190   : > { %696 = vadd.xlane.f32.xlu0 %v695_v11 }
 0x192   : > { %v722_v12 = vpop.permute.xlu1 %721 }
 0x193   : > { %v724_v13 = vsel %vm530_vm1, %v722_v12, 0.0 }
 0x194   : > { %725 = vadd.xlane.f32.xlu0 %v724_v13 }
 0x196   : > { %v751_v15 = vpop.permute.xlu1 %750 }
 0x197   : > { %v664_v14 = vpop.permute.xlu0 %663  ;;  %v753_v17 = vsel %vm530_vm1, %v751_v15, 0.0 }
 0x198   : > { %v666_v16 = vsel %vm530_vm1, %v664_v14, 0.0 }
 0x199   : > { %667 = vadd.xlane.f32.xlu1 %v666_v16 }
 0x19a   : > { %v715_v20 = vpop.permute.xlu1 %714 }
 0x19b   : > { %v686_v18 = vpop.permute.xlu0 %685  ;;  %v717_v21 = vsel %vm530_vm1, %v715_v20, 0.0 }
 0x19c   : > { %v688_v19 = vsel %vm530_vm1, %v686_v18, 0.0 }
 0x19d   : > { %754 = vadd.xlane.f32.xlu1 %v753_v17 }
 0x1a1   : > { %689 = vadd.xlane.f32.xlu1 %v688_v19 }
 0x1a5   : > { %718 = vadd.xlane.f32.xlu1 %v717_v21 }
 0x1aa   : > { %743 = vrot.lane.b32.xlu0 %v657_v5, %s1927_s28 }
 0x1c9   : > { %659 = vadd.xlane.f32.xlu0 %v658_v22 }
 0x21d   : > { %v697_v24 = vpop.xlane.xlu0 %696 }
 0x21e   : > { %v698_v28 = vmax.f32 %v697_v24, 1e-24 }
 0x221   : > { %v726_v25 = vpop.xlane.xlu0 %725 }
 0x222   : > { %v727_v26 = vmax.f32 %v726_v25, 1e-24 }
 0x224   : > { %1517 = vrsqrt.f32 %v727_v26 }
 0x225   : > { %v744_v27 = vpop.permute.xlu0 %743 }
 0x226   : > { %v668_v29 = vpop.xlane.xlu1 %667  ;;  %v746_v30 = vsel %vm530_vm1, %v744_v27, 0.0 }
 0x227   : > { %v669_v31 = vmax.f32 %v668_v29, 1e-24  ;;  %747 = vadd.xlane.f32.xlu0 %v746_v30  ;;  %v1514_v29 = vld [vmem:[#allocation13] sm:$0xff]  }
 0x229   : > { %1519 = vrsqrt.f32 %v669_v31 }
 0x22a   : > { %1521 = vrsqrt.f32 %v698_v28  ;;  %v755_v32 = vpop.xlane.xlu1 %754 }
 0x22b   : > { %v756_v33 = vmax.f32 %v755_v32, 1e-24 }
 0x22d   : > { %1523 = vrsqrt.f32 %v756_v33 }
 0x22e   : > { %v1518_v34 = vpop.eup %1517  ;;  %v690_v46 = vpop.xlane.xlu1 %689 }
 0x22f   : > { %v734_v39 = vmul.f32 %v1518_v34, %v2315_v2  ;;  %v691_v48 = vmax.f32 %v690_v46, 1e-24  ;;  %v1513_v34 = vld [vmem:[#allocation15] sm:$0xff]  }
 0x231   : > { %v1311_v43 = vpack.c.bf16 %v734_v39, %v734_v39  ;;  %1525 = vrsqrt.f32 %v691_v48 }
 0x232   : > { %v719_v47 = vpop.xlane.xlu1 %718 }
 0x233   : > { %v1520_v35 = vpop.eup %1519  ;;  %v720_v49 = vmax.f32 %v719_v47, 1e-24 }
 0x234   : > { %v1522_v36 = vpop.eup %1521  ;;  %v676_v37 = vmul.f32 %v1520_v35, %v2315_v2 }
 0x235   : > { %v705_v41 = vmul.f32 %v1522_v36, %v2315_v2  ;;  %1527 = vrsqrt.f32 %v720_v49  ;;  %v1516_v36 = vld [vmem:[#allocation13 + $0x8] sm:$0xff]  }
 0x236   : > { %v1309_v38 = vpack.c.bf16 %v676_v37, %v676_v37 }
 0x237   : > { %v1524_v40 = vpop.eup %1523  ;;  %v1310_v44 = vpack.c.bf16 %v705_v41, %v705_v41 }
 0x238   : > { %681 = vrot.lane.b32.xlu1 %v1309_v38, %s1924_s25  ;;  %v763_v42 = vmul.f32 %v1524_v40, %v2315_v2 }
 0x23a   : > { %v1312_v45 = vpack.c.bf16 %v763_v42, %v763_v42 }
 0x23b   : > { %v1526_v13 = vpop.eup %1525 }
 0x23c   : > { %739 = vrot.lane.b32.xlu1 %v1311_v43, %s1924_s25  ;;  %v700_v15 = vmul.f32 %v1526_v13, %v2315_v2 }
 0x23d   : > { %710 = vrot.lane.b32.xlu0 %v1310_v44, %s1924_s25 }
 0x23e   : > { %v701_v19 = vpack.c.bf16 %v700_v15, %v700_v15 }
 0x23f   : > { %v1528_v14 = vpop.eup %1527 }
 0x240   : > { %768 = vrot.lane.b32.xlu1 %v1312_v45, %s1924_s25  ;;  %v729_v16 = vmul.f32 %v1528_v14, %v2315_v2  ;;  %s1765_s25 = sshll.u32 %s1930_s12, 4  ;;  %s1766_s25 = int_to_ptr.vmem [resolvable:$false] %s1765_s25 }
 0x241   : > { %s1767_s21 = scalar_lea.vmem %s1766_s25, 256  ;;  %p1768_p9 = scmp.lt.s32.totalorder %s1036_s30, %s1766_s25 }
 0x242   : > { %v730_v20 = vpack.c.bf16 %v729_v16, %v729_v16  ;;  %p1769_p6 = scmp.lt.s32.totalorder %s1767_s21, %s1761_s7 }
 0x244   : > { %p1770_p2 = por %p1769_p6, %p1768_p9 }
 0x246   : > { %p1771_p8 = pnand %p1770_p2, %p1764_p11 }
 0x256   : > { %v660_v52 = vpop.xlane.xlu0 %659  ;;  %v1335_v53 = vpop.f32.mrb[0].mxu0 }
 0x257   : > { %v661_v55 = vmax.f32 %v660_v52, 1e-24  ;;  %v596_v56 = vmul.f32 %v1335_v53, %v592_v50  ;;  %v1341_v57 = vpop.f32.mrb[0].mxu1  ;;  %v575_v58 = vpop.f32.mrb[1].mxu0 }
 0x258   : > { %v653_v60 = vmul.f32 %v1341_v57, %v592_v50  ;;  %v594_v61 = vmul.f32 %v590_v51, %v575_v58  ;;  %v636_v62 = vpop.f32.mrb[1].mxu1  ;;  %v1336_v63 = vpop.f32.mrb[2].mxu0 }
 0x259   : > { %1529 = vrsqrt.f32 %v661_v55  ;;  %v651_v0 = vmul.f32 %v636_v62, %v590_v51  ;;  %v597_v1 = vmul.f32 %v1336_v63, %v593_v54  ;;  %v1342_v3 = vpop.f32.mrb[2].mxu1  ;;  %v578_v4 = vpop.f32.mrb[3].mxu0 }
 0x25a   : > { %v654_v5 = vmul.f32 %v1342_v3, %v593_v54  ;;  %v595_v6 = vmul.f32 %v591_v59, %v578_v4  ;;  %v639_v7 = vpop.f32.mrb[3].mxu1 }
 0x25b   : > { %v775_v8 = vpack.c.bf16 %v597_v1, %v596_v56  ;;  %v652_v9 = vmul.f32 %v639_v7, %v591_v59 }
 0x25c   : > { %v821_v10 = vpack.c.bf16 %v654_v5, %v653_v60  ;;  %v774_v11 = vpack.c.bf16 %v595_v6, %v594_v61 }
 0x25d   : > { %v820_v12 = vpack.c.bf16 %v652_v9, %v651_v0 }
 0x25e   : > { %1344 = vmatpush3.bf16.msra.mxu0 %v774_v11 }
 0x25f   : > { %1352 = vmatpush3.bf16.msra.mxu1 %v820_v12  ;;  %1345 = vmatprep.subr.bf16.mxu0 %v1928_v23 }
 0x260   : > { %1353 = vmatprep.subr.bf16.mxu1 %v1928_v23 }
 0x262   : > { %1346 = vmatpush3.bf16.msra.mxu0 %v775_v8 }
 0x263   : > { %v1530_v17 = vpop.eup %1529  ;;  %1354 = vmatpush3.bf16.msra.mxu1 %v821_v10  ;;  %1359 = vmatprep.subr.bf16.mxu0 %v1928_v23 }
 0x264   : > { %v671_v18 = vmul.f32 %v1530_v17, %v2315_v2  ;;  %1367 = vmatprep.subr.bf16.mxu1 %v1928_v23 }
 0x266   : > { %v672_v21 = vpack.c.bf16 %v671_v18, %v671_v18 }
 0x268   : > { %674 = vst.msk [vmem:[#allocation2] sm:$0xf] %vm673_vm3, %v672_v21 }
 0x269   : > { %703 = vst.msk [vmem:[#allocation2] sm:$0xf] %vm702_vm4, %v701_v19 }
 0x26a   : > { %732 = vst.msk [vmem:[#allocation2] sm:$0xf] %vm731_vm5, %v730_v20 }
 0x2aa   : > { %v682_v22 = vpop.permute.xlu1 %681 }
 0x2ab   : > { %684 = vst.msk [vmem:[#allocation3] sm:$0xf] %vm673_vm3, %v682_v22 }
 0x2ae   : > { %v740_v24 = vpop.permute.xlu1 %739 }
 0x2b2   : > { %v769_v28 = vpop.permute.xlu1 %768 }
 0x2b4   : > { %v748_v25 = vpop.xlane.xlu0 %747 }
 0x2b5   : > { %v749_v26 = vmax.f32 %v748_v25, 1e-24 }
 0x2b7   : > { %1531 = vrsqrt.f32 %v749_v26 }
 0x2b8   : > { %v711_v27 = vpop.permute.xlu0 %710 }
 0x2b9   : > { %713 = vst.msk [vmem:[#allocation3] sm:$0xf] %vm702_vm4, %v711_v27 }
 0x2ba   : > { %742 = vst.msk [vmem:[#allocation3] sm:$0xf] %vm731_vm5, %v740_v24 }
 0x2bb   : > { %771 = vst.msk [vmem:[#allocation3] sm:$0xf] %vm760_vm6, %v769_v28 }
 0x2c1   : > { %v1532_v30 = vpop.eup %1531 }
 0x2c2   : > { %v758_v31 = vmul.f32 %v1532_v30, %v2315_v2  ;;  %v773_v32 = vld [vmem:[#allocation3] sm:$0xf]  ;;  %v1515_v2 = vld [vmem:[#allocation15 + $0x8] sm:$0xff]  }
 0x2c3   : > { %1356 = vmatmul.mubr.msk.bf16.vlgmr.msra.gmra.mrb[4].mxu1 %vm776_vm7, %v773_v32 }
 0x2c4   : > { %v759_v33 = vpack.c.bf16 %v758_v31, %v758_v31  ;;  %1368 = vmatpush3.bf16.msra.mxu1 %v1514_v29  ;;  %1371 = vmatprep.mubr.msk.bf16.mxu1 %vm1929_vm2, %v1928_v23 }
 0x2c5   : > { %1369 = vmatprep.subr.bf16.mxu1 %v1928_v23 }
 0x2c6   : > { %761 = vst.msk [vmem:[#allocation2] sm:$0xf] %vm760_vm6, %v759_v33 }
 0x2c8   : > { %1370 = vmatpush3.bf16.msra.mxu1 %v1516_v36 }
 0x2cd   : > { %v772_v35 = vld [vmem:[#allocation2] sm:$0xf] }
 0x2ce   : > { %1348 = vmatmul.mubr.msk.bf16.vlgmr.msra.gmra.mrb[4].mxu0 %vm776_vm7, %v772_v35 }
 0x2cf   : > { %1360 = vmatpush3.bf16.msra.mxu0 %v1513_v34  ;;  %1363 = vmatprep.mubr.msk.bf16.mxu0 %vm1929_vm2, %v1928_v23 }
 0x2d0   : > { %1361 = vmatprep.subr.bf16.mxu0 %v1928_v23 }
 0x2d3   : > { %1362 = vmatpush3.bf16.msra.mxu0 %v1515_v2 }
 0x396   : > { %v859_v37 = vpop.f32.mrb[4].mxu1 }
 0x397   : > { %866 = vst.msk [vmem:[%s2363_s2] sm:$0xff] %vm776_vm7, %v859_v37  ;;  %v872_v38 = vpack.c.bf16 %v859_v37, %v859_v37  ;;  %v1357_v39 = vpop.f32.mrb[5].mxu1 }
 0x398   : > { %v862_v40 = vpop.f32.mrb[6].mxu1 }
 0x399   : > { %v1358_v41 = vpop.f32.mrb[7].mxu1  ;;  %1364 = vmatmul.mubr.msk.bf16.vlgmr.msra.gmra.mrb[8].mxu0 %vm776_vm7, %v872_v38 }
 0x3a1   : > { %v814_v23 = vpop.f32.mrb[4].mxu0 }
 0x3a2   : > { %865 = vst.msk [vmem:[%s503_s18] sm:$0xff] %vm776_vm7, %v814_v23  ;;  %v867_v42 = vpack.c.bf16 %v814_v23, %v814_v23  ;;  %v1349_v43 = vpop.f32.mrb[5].mxu0 }
 0x3a3   : > { %v817_v44 = vpop.f32.mrb[6].mxu0 }
 0x3a4   : > { %v1350_v45 = vpop.f32.mrb[7].mxu0  ;;  %1372 = vmatmul.mubr.msk.bf16.vlgmr.msra.gmra.mrb[8].mxu1 %vm776_vm7, %v867_v42 }
 0x3a5   : > { %1774 = shalt.err (!%p1771_p8)
}
 0x3a6   : > { %s1775_s20 = scalar_lea.hbm %s2376_s3, 128  ;;  %s1779_s5 = scalar_lea.hbm %s2479_s9, 256 }
 0x3a7   : > { %p1776_p12 = scmp.ne.s32.totalorder %s2376_s3, %s1775_s20  ;;  %p1780_p4 = scmp.lt.u32.totalorder %s2376_s3, %s2479_s9 }
 0x3a8   : > { %p1781_p1 = scmp.lt.u32.totalorder %s1779_s5, %s1775_s20  ;;  %p1783_p13 = scmp.lt.u32.totalorder %s1775_s20, %s2376_s3 }
 0x3a9   : > { %p1777_p5 = pnand %p1776_p12, %p2522_p0 }
 0x3aa   : > { %p1782_p3 = por %p1781_p1, %p1780_p4 }
 0x3ab   : > { %p1778_p7 = pneg %p1777_p5 }
 0x3ac   : > { %p1784_p10 = por %p1783_p13, %p1782_p3 }
 0x3ae   : > { %p1785_p11 = pnand %p1784_p10, %p1778_p7 }
 0x3b0   : > { %1788 = shalt.err (!%p1785_p11)
}
 0x3b1   : > { %1406 = dma.vmem_to_hbm [thread:$0]  (%p2522_p0), %s1036_s30, 128, %s2376_s3, %s2380_s17  }
 0x3b2   : > { %s1048_s4 = sshll.u32 %s2363_s2, 4  ;;  %s1046_s25 = scalar_lea.hbm %s2480_s10, %s1305_s27  ;;  %s1049_s4 = int_to_ptr.vmem [resolvable:$true] %s1048_s4 }
 0x3b3   : > { %s1789_s21 = scalar_lea.vmem %s1049_s4, 128  ;;  %s1931_s20 = smov [#allocation21]  }
 0x3b4   : > { %p1790_p9 = scmp.ne.s32.totalorder %s1049_s4, %s1789_s21  ;;  %s1793_s29 = sshll.u32 %s1931_s20, 4  ;;  %s1794_s29 = int_to_ptr.vmem [resolvable:$false] %s1793_s29 }
 0x3b5   : > { %s1795_s28 = scalar_lea.vmem %s1794_s29, 256  ;;  %p1796_p8 = scmp.lt.s32.totalorder %s1049_s4, %s1794_s29 }
 0x3b6   : > { %p1791_p6 = pnand %p1790_p9, %p2522_p0  ;;  %p1797_p12 = scmp.lt.s32.totalorder %s1795_s28, %s1789_s21 }
 0x3b8   : > { %p1792_p2 = pneg %p1791_p6  ;;  %p1798_p5 = por %p1797_p12, %p1796_p8 }
 0x3ba   : > { %p1799_p7 = pnand %p1798_p5, %p1792_p2 }
 0x3bc   : > { %1802 = shalt.err (!%p1799_p7)
}
 0x3bd   : > { %s1803_s2 = scalar_lea.hbm %s1046_s25, 128  ;;  %s1807_s30 = scalar_lea.hbm %s2480_s10, 256 }
 0x3be   : > { %p1804_p4 = scmp.ne.s32.totalorder %s1046_s25, %s1803_s2  ;;  %p1808_p13 = scmp.lt.u32.totalorder %s1046_s25, %s2480_s10 }
 0x3bf   : > { %p1809_p10 = scmp.lt.u32.totalorder %s1807_s30, %s1803_s2  ;;  %p1811_p9 = scmp.lt.u32.totalorder %s1803_s2, %s1046_s25 }
 0x3c0   : > { %p1805_p1 = pnand %p1804_p4, %p2522_p0 }
 0x3c1   : > { %p1810_p11 = por %p1809_p10, %p1808_p13 }
 0x3c2   : > { %p1806_p3 = pneg %p1805_p1 }
 0x3c3   : > { %p1812_p6 = por %p1811_p9, %p1810_p11 }
 0x3c5   : > { %p1813_p2 = pnand %p1812_p6, %p1806_p3 }
 0x3c7   : > { %1816 = shalt.err (!%p1813_p2)
}
 0x3c8   : > { %1407 = dma.vmem_to_hbm [thread:$0]  (%p2522_p0), %s1049_s4, 128, %s1046_s25, %s2380_s17   ;;  %v1300_v51 = vld [vmem:[#allocation16] ss:$0 sm:$0xff]  ;;  %vm996_vm8 = vcmask 257024  }
 0x3c9   : > { %s1304_s23 = sshll.u32 %s2009_s19, 6  ;;  %s496_s7 = scalar_lea.vmem [#allocation18], %s2283_s6 }
 0x3ca   : > { %s1022_s12 = sshll.u32 %s496_s7, 4  ;;  %s2424_s4 = scalar_lea.hbm %s2478_s8, %s1304_s23  ;;  %s2426_s12 = int_to_ptr.vmem [resolvable:$true] %s1022_s12 }
 0x3cb   : > { %s999_s25 = scalar_lea.sflag [#allocation6], %s2280_s26  ;;  %s1817_s20 = scalar_lea.vmem %s2426_s12, 64 }
 0x3cc   : > { %p1818_p8 = scmp.ne.s32.totalorder %s2426_s12, %s1817_s20  ;;  %s1932_s19 = smov [#allocation18]  }
 0x3cd   : > { %s1821_s6 = sshll.u32 %s1932_s19, 4  ;;  %s1822_s6 = int_to_ptr.vmem [resolvable:$false] %s1821_s6 }
 0x3ce   : > { %p1819_p12 = pnand %p1818_p8, %p2522_p0  ;;  %s1823_s29 = scalar_lea.vmem %s1822_s6, 128 }
 0x3cf   : > { %p1824_p7 = scmp.lt.s32.totalorder %s2426_s12, %s1822_s6  ;;  %p1825_p4 = scmp.lt.s32.totalorder %s1823_s29, %s1817_s20 }
 0x3d0   : > { %p1820_p5 = pneg %p1819_p12 }
 0x3d1   : > { %p1826_p1 = por %p1825_p4, %p1824_p7 }
 0x3d3   : > { %p1827_p3 = pnand %p1826_p1, %p1820_p5 }
 0x46c   : > { %v926_v46 = vpop.f32.mrb[8].mxu0 }
 0x46d   : > { %v1365_v47 = vpop.f32.mrb[9].mxu0 }
 0x46e   : > { %v929_v48 = vpop.f32.mrb[10].mxu0 }
 0x46f   : > { %v1366_v49 = vpop.f32.mrb[11].mxu0 }
 0x477   : > { %v981_v50 = vpop.f32.mrb[8].mxu1 }
 0x478   : > { %v982_v52 = vadd.f32 %v981_v50, %v926_v46  ;;  %v1373_v53 = vpop.f32.mrb[9].mxu1 }
 0x479   : > { %v984_v54 = vpop.f32.mrb[10].mxu1 }
 0x47a   : > { %v994_v55 = vadd.f32 %v1300_v51, %v982_v52  ;;  %v1374_v56 = vpop.f32.mrb[11].mxu1 }
 0x47c   : > { %v995_v57 = vpack.c.bf16 %v994_v55, %v994_v55 }
 0x47e   : > { %997 = vst.msk [vmem:[%s496_s7] sm:$0xf] %vm996_vm8, %v995_v57 }
 0x47f   : > { %1830 = shalt.err (!%p1827_p3)
}
 0x480   : > { %s1831_s26 = scalar_lea.hbm %s2424_s4, 64  ;;  %s1835_s27 = scalar_lea.hbm %s2478_s8, 128 }
 0x481   : > { %p1832_p13 = scmp.ne.s32.totalorder %s2424_s4, %s1831_s26  ;;  %p1836_p9 = scmp.lt.u32.totalorder %s2424_s4, %s2478_s8 }
 0x482   : > { %p1837_p6 = scmp.lt.u32.totalorder %s1835_s27, %s1831_s26  ;;  %p1839_p8 = scmp.lt.u32.totalorder %s1831_s26, %s2424_s4 }
 0x483   : > { %p1833_p10 = pnand %p1832_p13, %p2522_p0 }
 0x484   : > { %p1838_p2 = por %p1837_p6, %p1836_p9 }
 0x485   : > { %p1834_p11 = pneg %p1833_p10 }
 0x486   : > { %p1840_p12 = por %p1839_p8, %p1838_p2 }
 0x488   : > { %p1841_p5 = pnand %p1840_p12, %p1834_p11 }
 0x48a   : > { %1844 = shalt.err (!%p1841_p5)
}
 0x48b   : > { %1405 = dma.vmem_to_hbm [thread:$0]  (%p2522_p0), %s2426_s12, 64, %s2424_s4, %s999_s25  }
 0x48c PF: > { %s1060_s5 = sand.u32 1, %s1895_s13   ;;  %p2523_p7 = scmp.ne.s32.totalorder %s2510_s24, 0 }
 0x48d   : > { %p2524_p4 = scmp.ge.s32.totalorder %s1907_s16, 2  ;;  %s1061_s18 = scalar_lea.sflag [#allocation6], %s1060_s5 }
 0x48f   : > { %p1438_p1 = pnand %p2524_p4, %p2523_p7 }
 0x491   : > { %1886 = dma.done.wait (!%p1438_p1), %s1061_s18, 64  }
 0x492   : > { %1888 = vsyncadd (!%p1438_p1), %s1061_s18, 4294967232  ;;  %s2525_s23 = sadd.s32 4294967294, %s1907_s16  }
 0x493   : > { %s1069_s7 = sand.u32 1, %s2525_s23  }
 0x494   : > { %s1070_s21 = scalar_lea.sflag [#allocation20], %s1069_s7 }
 0x495   : > { %1890 = dma.done.wait (!%p1438_p1), %s1070_s21, 256  }
 0x496   : > { %1892 = vsyncadd (!%p1438_p1), %s1070_s21, 4294967040  ;;  %s2526_s22 = sld [smem:[#allocation30_spill]]  ;;  %p33_p0 = scmp.ge.s32.totalorder %s2171_s11, 4  }
 0x497   : > { %s2527_s13 = smov %s1899_s14  ;;  %s2528_s14 = smov %s1903_s15 }
 0x498   : > { %s2530_s16 = smov %s2171_s11  ;;  %35 = sbr.rel (!%p33_p0) target bundleno = 19 (0x13), region = 166 }
 0x49c   : > { %s2529_s15 = smov %s2526_s22 }
 0x49f   :  { %1084 = vsyncpa [#allocation5], 1 }
 0x4a0   :  { %1086 = vsyncpa [#allocation5 + $0x1], 1 }
 0x4a1   :  { %1087 = vsyncpa [#allocation8], 1 }
 0x4a2   :  { %1089 = vsyncpa [#allocation8 + $0x1], 1 }
 0x4a3   :  { %1090 = vsyncpa [#allocation11], 1 }
 0x4a4   :  { %1091 = vsyncpa [#allocation14], 1 }
 0x4a5   :  { %1092 = vsyncpa [#allocation17], 1 }
 0x4a6   :  { %1093 = vsyncpa [#allocation6], 1 }
 0x4a7   :  { %1095 = vsyncpa [#allocation6 + $0x1], 1 }
 0x4a8   :  { %1096 = vsyncpa [#allocation20], 1 }
 0x4a9   :  { %1098 = vsyncpa [#allocation20 + $0x1], 1 }

// kernel: block_forward.9
= control target key start
LH: loop header
LB: loop body
LE: loop exit
PB: predicated region body
PF: predicated region fallthrough
CT: control target
= control target key end

     0   :  { %9 = vsyncpa [#allocation3], 0  ;;  %s537_s0 = inlined_call_operand.hbm [shape: bf16[16,128], index: 0, kind: input, shape index: {}]   ;;  %s538_s1 = inlined_call_operand.hbm [shape: bf16[128,32], index: 1, kind: input, shape index: {}]   ;;  %s539_s2 = inlined_call_operand.hbm [shape: f32[1,32], index: 2, kind: input, shape index: {}]   ;;  %s540_s3 = inlined_call_operand.hbm [shape: f32[16,32], index: 3, kind: input, shape index: {}]   ;;  %s541_s4 = inlined_call_operand.hbm [shape: f32[16,32], index: 4, kind: output, shape index: {}]  }
   0x1   :  { %10 = vsyncpa [#allocation6], 0 }
   0x2   :  { %11 = vsyncpa [#allocation9], 0 }
   0x3   :  { %12 = vsyncpa [#allocation4], 0  ;;  %s415_s15 = smov [#allocation5]   ;;  %s416_s17 = smov [#allocation2]  }
   0x4   :  { %s30_s16 = sshll.u32 %s415_s15, 4  ;;  %s18_s18 = sshll.u32 %s416_s17, 4  ;;  %s31_s16 = int_to_ptr.vmem [resolvable:$true] %s30_s16  ;;  %s451_s18 = int_to_ptr.vmem [resolvable:$true] %s18_s18 }
   0x5   :  { %s297_s21 = scalar_lea.hbm %s538_s1, 1024 }
   0x6   :  { %p298_p0 = scmp.ne.s32.totalorder %s538_s1, %s297_s21  ;;  %p301_p1 = scmp.lt.u32.totalorder %s297_s21, %s538_s1 }
   0x8   :  { %p303_p2 = pnand %p301_p1, %p298_p0 }
   0xa   :  { %306 = shalt.err (!%p303_p2)
}
   0xb   :  { %s307_s26 = scalar_lea.vmem %s31_s16, 1024  ;;  %p312_p4 = scmp.lt.s32.totalorder %s31_s16, %s31_s16 }
   0xc   :  { %p308_p3 = scmp.ne.s32.totalorder %s31_s16, %s307_s26  ;;  %p313_p5 = scmp.lt.s32.totalorder %s307_s26, %s307_s26 }
   0xe   :  { %p314_p6 = por %p313_p5, %p312_p4 }
  0x10   :  { %p315_p7 = pnand %p314_p6, %p308_p3 }
  0x12   :  { %318 = shalt.err (!%p315_p7)
}
  0x13   :  { %s417_s27 = smov 64   ;;  %s418_s28 = smov 4  }
  0x14   :  { %36 = dma.hbm_to_vmem [thread:$0]  %s538_s1, 1024, %s31_s16, [#allocation6], %s417_s27, %s417_s27, %s418_s28  }
  0x15   :  { %s319_s7 = scalar_lea.hbm %s537_s0, 128 }
  0x16   :  { %p320_p8 = scmp.ne.s32.totalorder %s537_s0, %s319_s7  ;;  %p323_p9 = scmp.lt.u32.totalorder %s319_s7, %s537_s0 }
  0x18   :  { %p325_p10 = pnand %p323_p9, %p320_p8 }
  0x1a   :  { %328 = shalt.err (!%p325_p10)
}
  0x1b   :  { %s329_s12 = scalar_lea.vmem %s451_s18, 128  ;;  %p334_p12 = scmp.lt.s32.totalorder %s451_s18, %s451_s18 }
  0x1c   :  { %p330_p11 = scmp.ne.s32.totalorder %s451_s18, %s329_s12  ;;  %p335_p13 = scmp.lt.s32.totalorder %s329_s12, %s329_s12 }
  0x1e   :  { %p336_p0 = por %p335_p13, %p334_p12 }
  0x20   :  { %p337_p1 = pnand %p336_p0, %p330_p11 }
  0x22   :  { %340 = shalt.err (!%p337_p1)
}
  0x23   :  { %24 = dma.hbm_to_vmem [thread:$0]  %s537_s0, 128, %s451_s18, [#allocation3], %s417_s27, %s417_s27, %s418_s28  }
  0x24   :  { %s419_s14 = smov [#allocation7]   ;;  %s420_s16 = smov [#allocation8]  }
  0x25   :  { %s43_s15 = sshll.u32 %s419_s14, 4  ;;  %s52_s17 = sshll.u32 %s420_s16, 4  ;;  %s44_s15 = int_to_ptr.vmem [resolvable:$true] %s43_s15  ;;  %s482_s17 = int_to_ptr.vmem [resolvable:$true] %s52_s17 }
  0x26   :  { %s341_s21 = scalar_lea.hbm %s539_s2, 16 }
  0x27   :  { %p342_p2 = scmp.ne.s32.totalorder %s539_s2, %s341_s21  ;;  %p345_p3 = scmp.lt.u32.totalorder %s341_s21, %s539_s2 }
  0x29   :  { %p347_p4 = pnand %p345_p3, %p342_p2 }
  0x2b   :  { %350 = shalt.err (!%p347_p4)
}
  0x2c   :  { %s351_s0 = scalar_lea.vmem %s44_s15, 16  ;;  %s355_s18 = scalar_lea.vmem %s44_s15, 32 }
  0x2d   :  { %p352_p5 = scmp.ne.s32.totalorder %s44_s15, %s351_s0  ;;  %p356_p6 = scmp.lt.s32.totalorder %s44_s15, %s44_s15 }
  0x2e   :  { %p357_p7 = scmp.lt.s32.totalorder %s355_s18, %s351_s0 }
  0x30   :  { %p358_p8 = por %p357_p7, %p356_p6 }
  0x32   :  { %p359_p9 = pnand %p358_p8, %p352_p5 }
  0x34   :  { %362 = shalt.err (!%p359_p9)
}
  0x35   :  { %46 = dma.hbm_to_vmem [thread:$0]  %s539_s2, 16, %s44_s15, [#allocation6]  }
  0x36   :  { %s363_s30 = scalar_lea.hbm %s540_s3, 256 }
  0x37   :  { %p364_p10 = scmp.ne.s32.totalorder %s540_s3, %s363_s30  ;;  %p367_p11 = scmp.lt.u32.totalorder %s363_s30, %s540_s3 }
  0x39   :  { %p369_p12 = pnand %p367_p11, %p364_p10 }
  0x3b   :  { %372 = shalt.err (!%p369_p12)
}
  0x3c   :  { %s373_s9 = scalar_lea.vmem %s482_s17, 256  ;;  %p378_p0 = scmp.lt.s32.totalorder %s482_s17, %s482_s17 }
  0x3d   :  { %p374_p13 = scmp.ne.s32.totalorder %s482_s17, %s373_s9  ;;  %p379_p1 = scmp.lt.s32.totalorder %s373_s9, %s373_s9 }
  0x3f   :  { %p380_p2 = por %p379_p1, %p378_p0 }
  0x41   :  { %p381_p3 = pnand %p380_p2, %p374_p13 }
  0x43   :  { %384 = shalt.err (!%p381_p3)
}
  0x44   :  { %s421_s2 = smov 128   ;;  %s422_s10 = smov 8  }
  0x45   :  { %58 = dma.hbm_to_vmem [thread:$0]  %s540_s3, 256, %s482_s17, [#allocation9], %s421_s2, %s421_s2, %s422_s10  }
  0x46   :  { %407 = dma.done.wait [#allocation3], 128  }
  0x47   :  { %408 = vsyncadd [#allocation3], 4294967168 }
  0x48   :  { %409 = dma.done.wait [#allocation6], 1040  }
  0x49   :  { %410 = vsyncadd [#allocation6], 4294966256 }
  0x4a   :  { %411 = dma.done.wait [#allocation9], 256  }
  0x4b   :  { %412 = vsyncadd [#allocation9], 4294967040  ;;  %vm76_vm0 = vcmask 261120   ;;  %v423_v0 = vmov 0.0   ;;  %vm424_vm1 = vmmov 0   ;;  %v288_v1 = vld [vmem:[#allocation5] sm:$0xff]  }
  0x4c   :  { %257 = vmatprep.subr.bf16.mxu0 %v423_v0  ;;  %273 = vmatprep.mubr.msk.bf16.mxu0 %vm424_vm1, %v423_v0  ;;  %77 = vst.msk [vmem:[#allocation10] sm:$0xff] %vm76_vm0, %v423_v0  ;;  %78 = vst.msk [vmem:[#allocation10 + $0x8] sm:$0xff] %vm76_vm0, %v423_v0  ;;  %v289_v2 = vld [vmem:[#allocation5 + $0x8] sm:$0xff]   ;;  %v290_v3 = vld [vmem:[#allocation5 + $0x10] sm:$0xff]   ;;  %s425_s3 = smov [#allocation10]  }
  0x4d   :  { %258 = vmatpush3.bf16.msra.mxu0 %v288_v1  ;;  %v291_v4 = vld [vmem:[#allocation5 + $0x18] sm:$0xff]   ;;  %v292_v5 = vld [vmem:[#allocation5 + $0x20] sm:$0xff]   ;;  %v293_v6 = vld [vmem:[#allocation5 + $0x28] sm:$0xff]   ;;  %s224_s1 = sshll.u32 %s425_s3, 4  ;;  %s225_s1 = int_to_ptr.vmem [resolvable:$true] %s224_s1 }
  0x4e   :  { %259 = vmatprep.subr.bf16.mxu0 %v423_v0  ;;  %v294_v7 = vld [vmem:[#allocation5 + $0x30] sm:$0xff]   ;;  %v295_v8 = vld [vmem:[#allocation5 + $0x38] sm:$0xff]   ;;  %v247_v18 = vld [vmem:[#allocation7] ss:$0 sm:$0xff]  ;;  %s385_s13 = scalar_lea.vmem %s225_s1, 256  ;;  %p390_p5 = scmp.lt.s32.totalorder %s225_s1, %s225_s1 }
  0x4f   :  { %v296_v9 = vld [vmem:[#allocation2] sm:$0xff]   ;;  %v205_v19 = vld [vmem:[#allocation8] sm:$0xff]  ;;  %v206_v20 = vld [vmem:[#allocation8 + $0x8] sm:$0xff]  ;;  %p386_p4 = scmp.ne.s32.totalorder %s225_s1, %s385_s13  ;;  %p391_p6 = scmp.lt.s32.totalorder %s385_s13, %s385_s13 }
  0x50   :  { %v213_v21 = vadd.f32 %v247_v18, %v205_v19  ;;  %v214_v22 = vadd.f32 %v247_v18, %v206_v20 }
  0x51   :  { %260 = vmatpush3.bf16.msra.mxu0 %v289_v2  ;;  %p392_p7 = por %p391_p6, %p390_p5 }
  0x52   :  { %261 = vmatprep.subr.bf16.mxu0 %v423_v0 }
  0x53   :  { %v79_v10 = vld [vmem:[#allocation10] sm:$0xff]  ;;  %v80_v12 = vld [vmem:[#allocation10 + $0x8] sm:$0xff]  ;;  %p393_p8 = pnand %p392_p7, %p386_p4 }
  0x55   :  { %262 = vmatpush3.bf16.msra.mxu0 %v290_v3 }
  0x56   :  { %263 = vmatprep.subr.bf16.mxu0 %v423_v0 }
  0x59   :  { %264 = vmatpush3.bf16.msra.mxu0 %v291_v4 }
  0x5a   :  { %265 = vmatprep.subr.bf16.mxu0 %v423_v0 }
  0x5d   :  { %266 = vmatpush3.bf16.msra.mxu0 %v292_v5 }
  0x5e   :  { %267 = vmatprep.subr.bf16.mxu0 %v423_v0 }
  0x61   :  { %268 = vmatpush3.bf16.msra.mxu0 %v293_v6 }
  0x62   :  { %269 = vmatprep.subr.bf16.mxu0 %v423_v0 }
  0x65   :  { %270 = vmatpush3.bf16.msra.mxu0 %v294_v7 }
  0x66   :  { %271 = vmatprep.subr.bf16.mxu0 %v423_v0 }
  0x69   :  { %272 = vmatpush3.bf16.msra.mxu0 %v295_v8 }
  0x6c   :  { %274 = vmatmul.mubr.bf16.vlgmr.msra.gmra.mrb[0].mxu0 %v296_v9 }
 0x13f   :  { %v187_v11 = vpop.f32.mrb[0].mxu0 }
 0x140   :  { %v194_v13 = vadd.f32 %v187_v11, %v79_v10  ;;  %v275_v14 = vpop.f32.mrb[1].mxu0 }
 0x141   :  { %v190_v15 = vpop.f32.mrb[2].mxu0 }
 0x142   :  { %197 = vst.msk [vmem:[#allocation10] sm:$0xff] %vm76_vm0, %v194_v13  ;;  %v195_v16 = vadd.f32 %v190_v15, %v80_v12  ;;  %v276_v17 = vpop.f32.mrb[3].mxu0 }
 0x144   :  { %198 = vst.msk [vmem:[#allocation10 + $0x8] sm:$0xff] %vm76_vm0, %v195_v16 }
 0x149   :  { %v202_v23 = vld [vmem:[#allocation10] sm:$0xff] }
 0x14a   :  { %v215_v24 = vadd.f32 %v213_v21, %v202_v23 }
 0x14b   :  { %v203_v25 = vld [vmem:[#allocation10 + $0x8] sm:$0xff] }
 0x14c   :  { %v216_v26 = vadd.f32 %v214_v22, %v203_v25  ;;  %217 = vst.msk [vmem:[#allocation10] sm:$0xff] %vm76_vm0, %v215_v24 }
 0x14e   :  { %218 = vst.msk [vmem:[#allocation10 + $0x8] sm:$0xff] %vm76_vm0, %v216_v26 }
 0x14f   :  { %396 = shalt.err (!%p393_p8)
}
 0x150   :  { %s397_s16 = scalar_lea.hbm %s541_s4, 256 }
 0x151   :  { %p398_p9 = scmp.ne.s32.totalorder %s541_s4, %s397_s16  ;;  %p401_p10 = scmp.lt.u32.totalorder %s397_s16, %s541_s4 }
 0x153   :  { %p403_p11 = pnand %p401_p10, %p398_p9 }
 0x155   :  { %406 = shalt.err (!%p403_p11)
}
 0x156   :  { %230 = dma.vmem_to_hbm [thread:$0]  %s225_s1, 256, %s541_s4, [#allocation4], %s421_s2, %s421_s2, %s422_s10  }
 0x157   :  { %413 = dma.done.wait [#allocation4], 256  }
 0x158   :  { %414 = vsyncadd [#allocation4], 4294967040 }
 0x159   :  { %234 = vsyncpa [#allocation3], 1 }
 0x15a   :  { %235 = vsyncpa [#allocation6], 1 }
 0x15b   :  { %236 = vsyncpa [#allocation9], 1 }
 0x15c   :  { %237 = vsyncpa [#allocation4], 1 }

</bundles_post_ra>
